<compile_context>
chip_gen: v7x
topology: tpu7x:2x2x1
jax: 0.10.0
libtpu: 0.0.40
codegen_flags: <defaults>
</compile_context>

<pallas_src>
import numpy as np
import jax
import jax.numpy as jnp
from jax.experimental import pallas as pl
from jax.experimental.pallas import tpu as pltpu

# Small-but-consistent hyper-parameters (all are __init__ arguments of the
# PyTorch module, so shrinking them keeps the forward semantics identical).
FEAT_DIM = 128
HIDDEN_DIM = 64
REPARAM_DIM = 32
LATENT_DIM = 16
CLUSTER_EMBED_DIM = 32
CLUSTER_NUM = 27
NEIGHBOR_MAP_DIM = 101
TEMP = 0.5
BATCH = 8

LANE = 128

# ---------------- packed-slab layout (all row offsets are multiples of 128) --
_W128_KS = [("enc", 256), ("le", 128), ("mean", 128), ("lv", 128), ("ld", 128),
            ("fd", 256), ("cd1", 256), ("cd2", 128), ("cd3", 128), ("cdec", 128),
            ("nd", 256), ("nd1", 128), ("nd2", 128), ("nda1", 256), ("nd3", 128)]
_W256_KS = [("rd", 128), ("c2n", 128), ("nda0", 128)]


def _layout(ks):
    off, o = {}, 0
    for name, k in ks:
        off[name] = (o, k)
        o += k
    return off, o


W128_LAYOUT, W128_ROWS = _layout(_W128_KS)      # (2560, 128) slab
W256_LAYOUT, W256_ROWS = _layout(_W256_KS)      # (384, 256) slab
B128_ROW = {name: i for i, (name, _) in enumerate(_W128_KS)}
B256_ROW = {name: i for i, (name, _) in enumerate(_W256_KS)}
B128_ROWS = 16   # 15 biases, rounded up to a multiple of 8 sublanes
B256_ROWS = 8    # 3 biases, rounded up


# ------------------------------- kernel --------------------------------------
def hier_node_vae_kernel(act_ref, w128_ref, w256_ref, b128_ref, b256_ref, out_ref):
    relu = lambda v: jnp.maximum(v, 0.0)
    sig = jax.nn.sigmoid

    def mm128(x, name):
        o, k = W128_LAYOUT[name]
        r = B128_ROW[name]
        return (jnp.dot(x, w128_ref[o:o + k, :], preferred_element_type=jnp.float32)
                + b128_ref[r:r + 1, :])

    def mm256(x, name):
        o, k = W256_LAYOUT[name]
        r = B256_ROW[name]
        return (jnp.dot(x, w256_ref[o:o + k, :], preferred_element_type=jnp.float32)
                + b256_ref[r:r + 1, :])

    # activation slab: [feat(128) | neighbor(128) | eps_pad(128) | cemb_pad(128)]
    x_fn = act_ref[:, 0:256]
    eps_p = act_ref[:, 256:384]
    cemb_p = act_ref[:, 384:512]

    # ---------------- encoder ----------------
    # block-diag fuse of feat_encode / neighbor_encode: fn = [f(64) | n(64)]
    fn = relu(mm128(x_fn, "enc"))
    h = relu(mm128(fn, "le"))                 # true width 32, lanes 32: are 0
    mean = mm128(h, "mean")                   # true width 16, rest 0
    log_var = mm128(h, "lv")                  # true width 16, rest 0
    z = mean + eps_p * jnp.exp(log_var * 0.5)  # padded lanes stay 0

    # ---------------- decoder (training path) ----------------
    z1 = relu(mm128(z, "ld"))                 # true width 32
    zd = relu(mm256(z1, "rd"))                # [feat_h(0:64)|nb_h(64:128)|cl_h(128:192)|0]

    feat_dec = sig(mm128(zd, "fd"))           # fd weight lives in rows 0:64

    c = relu(mm128(zd, "cd1"))                # cd1 weight lives in rows 128:192
    c = relu(mm128(c, "cd2"))
    c = relu(mm128(c, "cd3"))
    cluster = sig(mm128(c, "cdec"))           # 1/temp pre-folded into weights/bias

    # cluster_to_neighbor, emitted pre-shifted into lanes 64:128 of a 256 slab
    c2n = relu(mm256(cemb_p, "c2n"))
    nf = relu(mm128(zd + c2n, "nd"))          # nd weight lives in rows 64:128
    nf = relu(mm128(nf, "nd1"))
    nf = relu(mm128(nf, "nd2"))
    nf = relu(mm256(nf, "nda0"))
    nf = relu(mm128(nf, "nda1"))
    nmap = sig(mm128(nf, "nd3"))              # 1/temp pre-folded into weights/bias

    # single lane-dense output slab, five unmasked 128-lane stores
    out_ref[:, 0:128] = feat_dec
    out_ref[:, 128:256] = nmap
    out_ref[:, 256:384] = cluster
    out_ref[:, 384:512] = mean
    out_ref[:, 512:640] = log_var


# ---------------------------- parameters -------------------------------------
def init_params(key):
    """Deterministic parameter init (PyTorch-like U(-1/sqrt(fan_in), +))."""
    def linear(k, fan_in, fan_out):
        k1, k2 = jax.random.split(k)
        bound = 1.0 / np.sqrt(fan_in)
        w = jax.random.uniform(k1, (fan_in, fan_out), jnp.float32, -bound, bound)
        b = jax.random.uniform(k2, (1, fan_out), jnp.float32, -bound, bound)
        return w, b

    keys = iter(jax.random.split(key, 32))
    p = {}
    # encoder
    p['fe'] = linear(next(keys), FEAT_DIM, HIDDEN_DIM)
    p['ne'] = linear(next(keys), FEAT_DIM, HIDDEN_DIM)
    p['le'] = linear(next(keys), HIDDEN_DIM * 2, REPARAM_DIM)
    p['mean'] = linear(next(keys), REPARAM_DIM, LATENT_DIM)
    p['lv'] = linear(next(keys), REPARAM_DIM, LATENT_DIM)
    # decoder
    p['ld'] = linear(next(keys), LATENT_DIM, REPARAM_DIM)
    p['rd'] = linear(next(keys), REPARAM_DIM, HIDDEN_DIM * 3)
    p['fd'] = linear(next(keys), HIDDEN_DIM, FEAT_DIM)
    p['nd'] = linear(next(keys), HIDDEN_DIM, HIDDEN_DIM * 2)
    p['nd1'] = linear(next(keys), HIDDEN_DIM * 2, HIDDEN_DIM * 2)
    p['nd2'] = linear(next(keys), HIDDEN_DIM * 2, HIDDEN_DIM * 2)
    p['nda0'] = linear(next(keys), HIDDEN_DIM * 2, HIDDEN_DIM * 4)
    p['nda1'] = linear(next(keys), HIDDEN_DIM * 4, HIDDEN_DIM * 2)
    p['nd3'] = linear(next(keys), HIDDEN_DIM * 2, NEIGHBOR_MAP_DIM)
    p['c2n'] = linear(next(keys), CLUSTER_EMBED_DIM, HIDDEN_DIM)
    p['cd1'] = linear(next(keys), HIDDEN_DIM, HIDDEN_DIM)
    p['cd2'] = linear(next(keys), HIDDEN_DIM, HIDDEN_DIM)
    p['cd3'] = linear(next(keys), HIDDEN_DIM, HIDDEN_DIM)
    p['cdec'] = linear(next(keys), HIDDEN_DIM, CLUSTER_NUM)
    p['emb'] = jax.random.normal(next(keys), (CLUSTER_NUM, CLUSTER_EMBED_DIM), jnp.float32)
    return p


def pack_params(params):
    """One-time packing of all weights/biases into pre-padded f32 slabs."""
    inv_t = np.float32(1.0 / TEMP)

    def g(name):
        w, b = params[name]
        return np.asarray(w, np.float32), np.asarray(b, np.float32).reshape(-1)

    w128 = np.zeros((W128_ROWS, 128), np.float32)
    w256 = np.zeros((W256_ROWS, 256), np.float32)
    b128 = np.zeros((B128_ROWS, 128), np.float32)
    b256 = np.zeros((B256_ROWS, 256), np.float32)

    def put128(name, w, b, r0=0, c0=0):
        o, _ = W128_LAYOUT[name]
        w128[o + r0:o + r0 + w.shape[0], c0:c0 + w.shape[1]] = w
        b128[B128_ROW[name], c0:c0 + b.shape[0]] = b

    def put256(name, w, b, r0=0, c0=0):
        o, _ = W256_LAYOUT[name]
        w256[o + r0:o + r0 + w.shape[0], c0:c0 + w.shape[1]] = w
        b256[B256_ROW[name], c0:c0 + b.shape[0]] = b

    H = HIDDEN_DIM
    fe_w, fe_b = g('fe')
    ne_w, ne_b = g('ne')
    put128('enc', fe_w, fe_b, r0=0, c0=0)           # block-diagonal fuse
    put128('enc', ne_w, ne_b, r0=FEAT_DIM, c0=H)
    put128('le', *g('le'))
    put128('mean', *g('mean'))
    put128('lv', *g('lv'))
    put128('ld', *g('ld'))
    put128('fd', *g('fd'), r0=0)                    # consumes feat_h = zd[:, 0:64]
    put128('cd1', *g('cd1'), r0=2 * H)              # consumes cl_h = zd[:, 128:192]
    put128('cd2', *g('cd2'))
    put128('cd3', *g('cd3'))
    cdec_w, cdec_b = g('cdec')
    put128('cdec', cdec_w * inv_t, cdec_b * inv_t)  # fold 1/temp
    put128('nd', *g('nd'), r0=H)                    # consumes nb_h(+c2n) lanes 64:128
    put128('nd1', *g('nd1'))
    put128('nd2', *g('nd2'))
    put128('nda1', *g('nda1'))
    nd3_w, nd3_b = g('nd3')
    put128('nd3', nd3_w * inv_t, nd3_b * inv_t)     # fold 1/temp

    put256('rd', *g('rd'))
    put256('c2n', *g('c2n'), c0=H)                  # pre-shift into nb_h lane block
    put256('nda0', *g('nda0'))

    emb = np.asarray(params['emb'], np.float32)
    emb128 = np.zeros((CLUSTER_NUM, 128), np.float32)
    emb128[:, :CLUSTER_EMBED_DIM] = emb

    return {'w128': jnp.asarray(w128), 'w256': jnp.asarray(w256),
            'b128': jnp.asarray(b128), 'b256': jnp.asarray(b256),
            'emb128': jnp.asarray(emb128)}


# ------------------------------- forward -------------------------------------
@jax.jit
def _forward_arrays(packed, feat, neighbor_feat, cluster_ind, eps):
    B = feat.shape[0]

    # Glue: embedding lookup (nn.Embedding) + pack activations into one slab.
    cemb_p = packed['emb128'][cluster_ind]                          # (B, 128)
    eps_p = jnp.pad(eps, ((0, 0), (0, LANE - LATENT_DIM)))          # (B, 128)
    acts = jnp.concatenate([feat, neighbor_feat, eps_p, cemb_p], axis=1)  # (B, 512)

    vmem = pl.BlockSpec(memory_space=pltpu.MemorySpace.VMEM)
    out = pl.pallas_call(
        hier_node_vae_kernel,
        out_shape=jax.ShapeDtypeStruct((B, 5 * LANE), jnp.float32),
        in_specs=[vmem] * 5,
        out_specs=vmem,
    )(acts, packed['w128'], packed['w256'], packed['b128'], packed['b256'])

    feat_o = out[:, 0:FEAT_DIM]
    nmap = out[:, 128:128 + NEIGHBOR_MAP_DIM]
    cluster = out[:, 256:256 + CLUSTER_NUM]
    mean = out[:, 384:384 + LATENT_DIM]
    log_var = out[:, 512:512 + LATENT_DIM]
    return feat_o, nmap, cluster, mean, log_var


def hier_node_vae_forward(packed, feat, neighbor_feat, cluster_ind, eps):
    feat_o, nmap, cluster, mean, log_var = _forward_arrays(
        packed, feat, neighbor_feat, cluster_ind, eps)
    # training mode: neighbor_map_ingraph == 1
    return feat_o, nmap, cluster, 1, mean, log_var


# ------------------------------ reference ------------------------------------
def reference_forward(params, feat, neighbor_feat, cluster_ind, eps):
    """Pure-JAX reference mirroring the PyTorch training-mode forward."""
    hi = jax.lax.Precision.HIGHEST

    def lin(x, p):
        w, b = p
        return jnp.dot(x, w, precision=hi) + b[0]

    relu = lambda x: jnp.maximum(x, 0.0)
    sig = jax.nn.sigmoid

    f = relu(lin(feat, params['fe']))
    n = relu(lin(neighbor_feat, params['ne']))
    h = relu(lin(jnp.concatenate([f, n], axis=1), params['le']))
    mean = lin(h, params['mean'])
    log_var = lin(h, params['lv'])
    z = mean + eps * jnp.exp(log_var * 0.5)

    z1 = relu(lin(z, params['ld']))
    z2 = relu(lin(z1, params['rd']))
    feat_h, nb_h, cl_h = jnp.split(z2, 3, axis=-1)

    feat_o = sig(lin(feat_h, params['fd']))

    c = relu(lin(cl_h, params['cd1']))
    c = relu(lin(c, params['cd2']))
    c = relu(lin(c, params['cd3']))
    c = sig(lin(c, params['cdec']) / TEMP)

    cemb = params['emb'][cluster_ind]
    c2n = relu(lin(cemb, params['c2n']))
    nf = relu(lin(nb_h + c2n, params['nd']))
    nf = relu(lin(nf, params['nd1']))
    nf = relu(lin(nf, params['nd2']))
    nf = relu(lin(nf, params['nda0']))
    nf = relu(lin(nf, params['nda1']))
    nf = lin(nf, params['nd3'])
    nmap = sig(nf / TEMP)
    return feat_o, nmap, c, 1, mean, log_var


if __name__ == "__main__":
    key = jax.random.PRNGKey(0)
    kp, kf, kn, kc, ke = jax.random.split(key, 5)

    params = init_params(kp)
    packed = pack_params(params)          # one-time weight packing

    feat = jax.random.normal(kf, (BATCH, FEAT_DIM), jnp.float32)
    neighbor_feat = jax.random.normal(kn, (BATCH, FEAT_DIM), jnp.float32)
    cluster_ind = jax.random.randint(kc, (BATCH,), 0, CLUSTER_NUM)
    eps = jax.random.normal(ke, (BATCH, LATENT_DIM), jnp.float32)  # randn_like noise

    outs = hier_node_vae_forward(packed, feat, neighbor_feat, cluster_ind, eps)
    feat_o, nmap, cluster, _, mean, log_var = outs
    jax.block_until_ready((feat_o, nmap, cluster, mean, log_var))

    ref = reference_forward(params, feat, neighbor_feat, cluster_ind, eps)
    for got, want in zip((feat_o, nmap, cluster, mean, log_var),
                         (ref[0], ref[1], ref[2], ref[4], ref[5])):
        np.testing.assert_allclose(np.asarray(got), np.asarray(want),
                                   rtol=2e-3, atol=2e-3)

    print("KERNEL_OK")
</pallas_src>

<mosaic_0001>
module attributes {stable_mosaic.version = 11 : i64} {
  func.func @hier_node_vae_kernel(%arg0: memref<8x512xf32, #tpu.memory_space<vmem>>, %arg1: memref<2560x128xf32, #tpu.memory_space<vmem>>, %arg2: memref<384x256xf32, #tpu.memory_space<vmem>>, %arg3: memref<16x128xf32, #tpu.memory_space<vmem>>, %arg4: memref<8x256xf32, #tpu.memory_space<vmem>>, %arg5: memref<8x640xf32, #tpu.memory_space<vmem>>) attributes {dimension_semantics = [], scalar_prefetch = 0 : i64, scratch_operands = 0 : i64, tpu.core_type = #tpu.core_type<tc>} {
    %c0 = arith.constant 0 : index
    %c0_0 = arith.constant 0 : index
    %0 = vector.load %arg0[%c0, %c0_0] : memref<8x512xf32, #tpu.memory_space<vmem>>, vector<8x256xf32>
    %c0_1 = arith.constant 0 : index
    %c256 = arith.constant 256 : index
    %1 = vector.load %arg0[%c0_1, %c256] : memref<8x512xf32, #tpu.memory_space<vmem>>, vector<8x128xf32>
    %c0_2 = arith.constant 0 : index
    %c384 = arith.constant 384 : index
    %2 = vector.load %arg0[%c0_2, %c384] : memref<8x512xf32, #tpu.memory_space<vmem>>, vector<8x128xf32>
    %c0_3 = arith.constant 0 : index
    %c0_4 = arith.constant 0 : index
    %3 = vector.load %arg1[%c0_3, %c0_4] : memref<2560x128xf32, #tpu.memory_space<vmem>>, vector<256x128xf32>
    %cst = arith.constant dense<0.000000e+00> : vector<8x128xf32>
    %4 = tpu.matmul %0, %3, %cst {dimension_numbers = #tpu.dot_dimension_numbers<[1], [0], [0], [1], [0, 0, 1, 1], [], []>} : vector<8x256xf32>, vector<256x128xf32>, vector<8x128xf32> -> vector<8x128xf32>
    %c0_5 = arith.constant 0 : index
    %c0_6 = arith.constant 0 : index
    %5 = vector.load %arg3[%c0_5, %c0_6] : memref<16x128xf32, #tpu.memory_space<vmem>>, vector<1x128xf32>
    %6 = vector.broadcast %5 : vector<1x128xf32> to vector<8x128xf32>
    %7 = arith.addf %4, %6 : vector<8x128xf32>
    %cst_7 = arith.constant 0.000000e+00 : f32
    %8 = vector.broadcast %cst_7 : f32 to vector<8x128xf32>
    %9 = arith.maximumf %7, %8 : vector<8x128xf32>
    %c256_8 = arith.constant 256 : index
    %c0_9 = arith.constant 0 : index
    %10 = vector.load %arg1[%c256_8, %c0_9] : memref<2560x128xf32, #tpu.memory_space<vmem>>, vector<128x128xf32>
    %cst_10 = arith.constant dense<0.000000e+00> : vector<8x128xf32>
    %11 = tpu.matmul %9, %10, %cst_10 {dimension_numbers = #tpu.dot_dimension_numbers<[1], [0], [0], [1], [0, 0, 1, 1], [], []>} : vector<8x128xf32>, vector<128x128xf32>, vector<8x128xf32> -> vector<8x128xf32>
    %c1 = arith.constant 1 : index
    %c0_11 = arith.constant 0 : index
    %12 = vector.load %arg3[%c1, %c0_11] : memref<16x128xf32, #tpu.memory_space<vmem>>, vector<1x128xf32>
    %13 = vector.broadcast %12 : vector<1x128xf32> to vector<8x128xf32>
    %14 = arith.addf %11, %13 : vector<8x128xf32>
    %cst_12 = arith.constant 0.000000e+00 : f32
    %15 = vector.broadcast %cst_12 : f32 to vector<8x128xf32>
    %16 = arith.maximumf %14, %15 : vector<8x128xf32>
    %c384_13 = arith.constant 384 : index
    %c0_14 = arith.constant 0 : index
    %17 = vector.load %arg1[%c384_13, %c0_14] : memref<2560x128xf32, #tpu.memory_space<vmem>>, vector<128x128xf32>
    %cst_15 = arith.constant dense<0.000000e+00> : vector<8x128xf32>
    %18 = tpu.matmul %16, %17, %cst_15 {dimension_numbers = #tpu.dot_dimension_numbers<[1], [0], [0], [1], [0, 0, 1, 1], [], []>} : vector<8x128xf32>, vector<128x128xf32>, vector<8x128xf32> -> vector<8x128xf32>
    %c2 = arith.constant 2 : index
    %c0_16 = arith.constant 0 : index
    %19 = vector.load %arg3[%c2, %c0_16] : memref<16x128xf32, #tpu.memory_space<vmem>>, vector<1x128xf32>
    %20 = vector.broadcast %19 : vector<1x128xf32> to vector<8x128xf32>
    %21 = arith.addf %18, %20 : vector<8x128xf32>
    %c512 = arith.constant 512 : index
    %c0_17 = arith.constant 0 : index
    %22 = vector.load %arg1[%c512, %c0_17] : memref<2560x128xf32, #tpu.memory_space<vmem>>, vector<128x128xf32>
    %cst_18 = arith.constant dense<0.000000e+00> : vector<8x128xf32>
    %23 = tpu.matmul %16, %22, %cst_18 {dimension_numbers = #tpu.dot_dimension_numbers<[1], [0], [0], [1], [0, 0, 1, 1], [], []>} : vector<8x128xf32>, vector<128x128xf32>, vector<8x128xf32> -> vector<8x128xf32>
    %c3 = arith.constant 3 : index
    %c0_19 = arith.constant 0 : index
    %24 = vector.load %arg3[%c3, %c0_19] : memref<16x128xf32, #tpu.memory_space<vmem>>, vector<1x128xf32>
    %25 = vector.broadcast %24 : vector<1x128xf32> to vector<8x128xf32>
    %26 = arith.addf %23, %25 : vector<8x128xf32>
    %cst_20 = arith.constant 5.000000e-01 : f32
    %27 = vector.broadcast %cst_20 : f32 to vector<8x128xf32>
    %28 = arith.mulf %26, %27 : vector<8x128xf32>
    %29 = math.exp %28 : vector<8x128xf32>
    %30 = arith.mulf %1, %29 : vector<8x128xf32>
    %31 = arith.addf %21, %30 : vector<8x128xf32>
    %c640 = arith.constant 640 : index
    %c0_21 = arith.constant 0 : index
    %32 = vector.load %arg1[%c640, %c0_21] : memref<2560x128xf32, #tpu.memory_space<vmem>>, vector<128x128xf32>
    %cst_22 = arith.constant dense<0.000000e+00> : vector<8x128xf32>
    %33 = tpu.matmul %31, %32, %cst_22 {dimension_numbers = #tpu.dot_dimension_numbers<[1], [0], [0], [1], [0, 0, 1, 1], [], []>} : vector<8x128xf32>, vector<128x128xf32>, vector<8x128xf32> -> vector<8x128xf32>
    %c4 = arith.constant 4 : index
    %c0_23 = arith.constant 0 : index
    %34 = vector.load %arg3[%c4, %c0_23] : memref<16x128xf32, #tpu.memory_space<vmem>>, vector<1x128xf32>
    %35 = vector.broadcast %34 : vector<1x128xf32> to vector<8x128xf32>
    %36 = arith.addf %33, %35 : vector<8x128xf32>
    %cst_24 = arith.constant 0.000000e+00 : f32
    %37 = vector.broadcast %cst_24 : f32 to vector<8x128xf32>
    %38 = arith.maximumf %36, %37 : vector<8x128xf32>
    %c0_25 = arith.constant 0 : index
    %c0_26 = arith.constant 0 : index
    %39 = vector.load %arg2[%c0_25, %c0_26] : memref<384x256xf32, #tpu.memory_space<vmem>>, vector<128x256xf32>
    %cst_27 = arith.constant dense<0.000000e+00> : vector<8x256xf32>
    %40 = tpu.matmul %38, %39, %cst_27 {dimension_numbers = #tpu.dot_dimension_numbers<[1], [0], [0], [1], [0, 0, 1, 1], [], []>} : vector<8x128xf32>, vector<128x256xf32>, vector<8x256xf32> -> vector<8x256xf32>
    %c0_28 = arith.constant 0 : index
    %c0_29 = arith.constant 0 : index
    %41 = vector.load %arg4[%c0_28, %c0_29] : memref<8x256xf32, #tpu.memory_space<vmem>>, vector<1x256xf32>
    %42 = vector.broadcast %41 : vector<1x256xf32> to vector<8x256xf32>
    %43 = arith.addf %40, %42 : vector<8x256xf32>
    %cst_30 = arith.constant 0.000000e+00 : f32
    %44 = vector.broadcast %cst_30 : f32 to vector<8x256xf32>
    %45 = arith.maximumf %43, %44 : vector<8x256xf32>
    %c768 = arith.constant 768 : index
    %c0_31 = arith.constant 0 : index
    %46 = vector.load %arg1[%c768, %c0_31] : memref<2560x128xf32, #tpu.memory_space<vmem>>, vector<256x128xf32>
    %cst_32 = arith.constant dense<0.000000e+00> : vector<8x128xf32>
    %47 = tpu.matmul %45, %46, %cst_32 {dimension_numbers = #tpu.dot_dimension_numbers<[1], [0], [0], [1], [0, 0, 1, 1], [], []>} : vector<8x256xf32>, vector<256x128xf32>, vector<8x128xf32> -> vector<8x128xf32>
    %c5 = arith.constant 5 : index
    %c0_33 = arith.constant 0 : index
    %48 = vector.load %arg3[%c5, %c0_33] : memref<16x128xf32, #tpu.memory_space<vmem>>, vector<1x128xf32>
    %49 = vector.broadcast %48 : vector<1x128xf32> to vector<8x128xf32>
    %50 = arith.addf %47, %49 : vector<8x128xf32>
    %51 = arith.negf %50 : vector<8x128xf32>
    %52 = math.exp %51 : vector<8x128xf32>
    %cst_34 = arith.constant 1.000000e+00 : f32
    %53 = vector.broadcast %cst_34 : f32 to vector<8x128xf32>
    %54 = arith.addf %53, %52 : vector<8x128xf32>
    %55 = arith.divf %53, %54 : vector<8x128xf32>
    %c1024 = arith.constant 1024 : index
    %c0_35 = arith.constant 0 : index
    %56 = vector.load %arg1[%c1024, %c0_35] : memref<2560x128xf32, #tpu.memory_space<vmem>>, vector<256x128xf32>
    %cst_36 = arith.constant dense<0.000000e+00> : vector<8x128xf32>
    %57 = tpu.matmul %45, %56, %cst_36 {dimension_numbers = #tpu.dot_dimension_numbers<[1], [0], [0], [1], [0, 0, 1, 1], [], []>} : vector<8x256xf32>, vector<256x128xf32>, vector<8x128xf32> -> vector<8x128xf32>
    %c6 = arith.constant 6 : index
    %c0_37 = arith.constant 0 : index
    %58 = vector.load %arg3[%c6, %c0_37] : memref<16x128xf32, #tpu.memory_space<vmem>>, vector<1x128xf32>
    %59 = vector.broadcast %58 : vector<1x128xf32> to vector<8x128xf32>
    %60 = arith.addf %57, %59 : vector<8x128xf32>
    %cst_38 = arith.constant 0.000000e+00 : f32
    %61 = vector.broadcast %cst_38 : f32 to vector<8x128xf32>
    %62 = arith.maximumf %60, %61 : vector<8x128xf32>
    %c1280 = arith.constant 1280 : index
    %c0_39 = arith.constant 0 : index
    %63 = vector.load %arg1[%c1280, %c0_39] : memref<2560x128xf32, #tpu.memory_space<vmem>>, vector<128x128xf32>
    %cst_40 = arith.constant dense<0.000000e+00> : vector<8x128xf32>
    %64 = tpu.matmul %62, %63, %cst_40 {dimension_numbers = #tpu.dot_dimension_numbers<[1], [0], [0], [1], [0, 0, 1, 1], [], []>} : vector<8x128xf32>, vector<128x128xf32>, vector<8x128xf32> -> vector<8x128xf32>
    %c7 = arith.constant 7 : index
    %c0_41 = arith.constant 0 : index
    %65 = vector.load %arg3[%c7, %c0_41] : memref<16x128xf32, #tpu.memory_space<vmem>>, vector<1x128xf32>
    %66 = vector.broadcast %65 : vector<1x128xf32> to vector<8x128xf32>
    %67 = arith.addf %64, %66 : vector<8x128xf32>
    %cst_42 = arith.constant 0.000000e+00 : f32
    %68 = vector.broadcast %cst_42 : f32 to vector<8x128xf32>
    %69 = arith.maximumf %67, %68 : vector<8x128xf32>
    %c1408 = arith.constant 1408 : index
    %c0_43 = arith.constant 0 : index
    %70 = vector.load %arg1[%c1408, %c0_43] : memref<2560x128xf32, #tpu.memory_space<vmem>>, vector<128x128xf32>
    %cst_44 = arith.constant dense<0.000000e+00> : vector<8x128xf32>
    %71 = tpu.matmul %69, %70, %cst_44 {dimension_numbers = #tpu.dot_dimension_numbers<[1], [0], [0], [1], [0, 0, 1, 1], [], []>} : vector<8x128xf32>, vector<128x128xf32>, vector<8x128xf32> -> vector<8x128xf32>
    %c8 = arith.constant 8 : index
    %c0_45 = arith.constant 0 : index
    %72 = vector.load %arg3[%c8, %c0_45] : memref<16x128xf32, #tpu.memory_space<vmem>>, vector<1x128xf32>
    %73 = vector.broadcast %72 : vector<1x128xf32> to vector<8x128xf32>
    %74 = arith.addf %71, %73 : vector<8x128xf32>
    %cst_46 = arith.constant 0.000000e+00 : f32
    %75 = vector.broadcast %cst_46 : f32 to vector<8x128xf32>
    %76 = arith.maximumf %74, %75 : vector<8x128xf32>
    %c1536 = arith.constant 1536 : index
    %c0_47 = arith.constant 0 : index
    %77 = vector.load %arg1[%c1536, %c0_47] : memref<2560x128xf32, #tpu.memory_space<vmem>>, vector<128x128xf32>
    %cst_48 = arith.constant dense<0.000000e+00> : vector<8x128xf32>
    %78 = tpu.matmul %76, %77, %cst_48 {dimension_numbers = #tpu.dot_dimension_numbers<[1], [0], [0], [1], [0, 0, 1, 1], [], []>} : vector<8x128xf32>, vector<128x128xf32>, vector<8x128xf32> -> vector<8x128xf32>
    %c9 = arith.constant 9 : index
    %c0_49 = arith.constant 0 : index
    %79 = vector.load %arg3[%c9, %c0_49] : memref<16x128xf32, #tpu.memory_space<vmem>>, vector<1x128xf32>
    %80 = vector.broadcast %79 : vector<1x128xf32> to vector<8x128xf32>
    %81 = arith.addf %78, %80 : vector<8x128xf32>
    %82 = arith.negf %81 : vector<8x128xf32>
    %83 = math.exp %82 : vector<8x128xf32>
    %cst_50 = arith.constant 1.000000e+00 : f32
    %84 = vector.broadcast %cst_50 : f32 to vector<8x128xf32>
    %85 = arith.addf %84, %83 : vector<8x128xf32>
    %86 = arith.divf %84, %85 : vector<8x128xf32>
    %c128 = arith.constant 128 : index
    %c0_51 = arith.constant 0 : index
    %87 = vector.load %arg2[%c128, %c0_51] : memref<384x256xf32, #tpu.memory_space<vmem>>, vector<128x256xf32>
    %cst_52 = arith.constant dense<0.000000e+00> : vector<8x256xf32>
    %88 = tpu.matmul %2, %87, %cst_52 {dimension_numbers = #tpu.dot_dimension_numbers<[1], [0], [0], [1], [0, 0, 1, 1], [], []>} : vector<8x128xf32>, vector<128x256xf32>, vector<8x256xf32> -> vector<8x256xf32>
    %c1_53 = arith.constant 1 : index
    %c0_54 = arith.constant 0 : index
    %89 = vector.load %arg4[%c1_53, %c0_54] : memref<8x256xf32, #tpu.memory_space<vmem>>, vector<1x256xf32>
    %90 = vector.broadcast %89 : vector<1x256xf32> to vector<8x256xf32>
    %91 = arith.addf %88, %90 : vector<8x256xf32>
    %cst_55 = arith.constant 0.000000e+00 : f32
    %92 = vector.broadcast %cst_55 : f32 to vector<8x256xf32>
    %93 = arith.maximumf %91, %92 : vector<8x256xf32>
    %94 = arith.addf %45, %93 : vector<8x256xf32>
    %c1664 = arith.constant 1664 : index
    %c0_56 = arith.constant 0 : index
    %95 = vector.load %arg1[%c1664, %c0_56] : memref<2560x128xf32, #tpu.memory_space<vmem>>, vector<256x128xf32>
    %cst_57 = arith.constant dense<0.000000e+00> : vector<8x128xf32>
    %96 = tpu.matmul %94, %95, %cst_57 {dimension_numbers = #tpu.dot_dimension_numbers<[1], [0], [0], [1], [0, 0, 1, 1], [], []>} : vector<8x256xf32>, vector<256x128xf32>, vector<8x128xf32> -> vector<8x128xf32>
    %c10 = arith.constant 10 : index
    %c0_58 = arith.constant 0 : index
    %97 = vector.load %arg3[%c10, %c0_58] : memref<16x128xf32, #tpu.memory_space<vmem>>, vector<1x128xf32>
    %98 = vector.broadcast %97 : vector<1x128xf32> to vector<8x128xf32>
    %99 = arith.addf %96, %98 : vector<8x128xf32>
    %cst_59 = arith.constant 0.000000e+00 : f32
    %100 = vector.broadcast %cst_59 : f32 to vector<8x128xf32>
    %101 = arith.maximumf %99, %100 : vector<8x128xf32>
    %c1920 = arith.constant 1920 : index
    %c0_60 = arith.constant 0 : index
    %102 = vector.load %arg1[%c1920, %c0_60] : memref<2560x128xf32, #tpu.memory_space<vmem>>, vector<128x128xf32>
    %cst_61 = arith.constant dense<0.000000e+00> : vector<8x128xf32>
    %103 = tpu.matmul %101, %102, %cst_61 {dimension_numbers = #tpu.dot_dimension_numbers<[1], [0], [0], [1], [0, 0, 1, 1], [], []>} : vector<8x128xf32>, vector<128x128xf32>, vector<8x128xf32> -> vector<8x128xf32>
    %c11 = arith.constant 11 : index
    %c0_62 = arith.constant 0 : index
    %104 = vector.load %arg3[%c11, %c0_62] : memref<16x128xf32, #tpu.memory_space<vmem>>, vector<1x128xf32>
    %105 = vector.broadcast %104 : vector<1x128xf32> to vector<8x128xf32>
    %106 = arith.addf %103, %105 : vector<8x128xf32>
    %cst_63 = arith.constant 0.000000e+00 : f32
    %107 = vector.broadcast %cst_63 : f32 to vector<8x128xf32>
    %108 = arith.maximumf %106, %107 : vector<8x128xf32>
    %c2048 = arith.constant 2048 : index
    %c0_64 = arith.constant 0 : index
    %109 = vector.load %arg1[%c2048, %c0_64] : memref<2560x128xf32, #tpu.memory_space<vmem>>, vector<128x128xf32>
    %cst_65 = arith.constant dense<0.000000e+00> : vector<8x128xf32>
    %110 = tpu.matmul %108, %109, %cst_65 {dimension_numbers = #tpu.dot_dimension_numbers<[1], [0], [0], [1], [0, 0, 1, 1], [], []>} : vector<8x128xf32>, vector<128x128xf32>, vector<8x128xf32> -> vector<8x128xf32>
    %c12 = arith.constant 12 : index
    %c0_66 = arith.constant 0 : index
    %111 = vector.load %arg3[%c12, %c0_66] : memref<16x128xf32, #tpu.memory_space<vmem>>, vector<1x128xf32>
    %112 = vector.broadcast %111 : vector<1x128xf32> to vector<8x128xf32>
    %113 = arith.addf %110, %112 : vector<8x128xf32>
    %cst_67 = arith.constant 0.000000e+00 : f32
    %114 = vector.broadcast %cst_67 : f32 to vector<8x128xf32>
    %115 = arith.maximumf %113, %114 : vector<8x128xf32>
    %c256_68 = arith.constant 256 : index
    %c0_69 = arith.constant 0 : index
    %116 = vector.load %arg2[%c256_68, %c0_69] : memref<384x256xf32, #tpu.memory_space<vmem>>, vector<128x256xf32>
    %cst_70 = arith.constant dense<0.000000e+00> : vector<8x256xf32>
    %117 = tpu.matmul %115, %116, %cst_70 {dimension_numbers = #tpu.dot_dimension_numbers<[1], [0], [0], [1], [0, 0, 1, 1], [], []>} : vector<8x128xf32>, vector<128x256xf32>, vector<8x256xf32> -> vector<8x256xf32>
    %c2_71 = arith.constant 2 : index
    %c0_72 = arith.constant 0 : index
    %118 = vector.load %arg4[%c2_71, %c0_72] : memref<8x256xf32, #tpu.memory_space<vmem>>, vector<1x256xf32>
    %119 = vector.broadcast %118 : vector<1x256xf32> to vector<8x256xf32>
    %120 = arith.addf %117, %119 : vector<8x256xf32>
    %cst_73 = arith.constant 0.000000e+00 : f32
    %121 = vector.broadcast %cst_73 : f32 to vector<8x256xf32>
    %122 = arith.maximumf %120, %121 : vector<8x256xf32>
    %c2176 = arith.constant 2176 : index
    %c0_74 = arith.constant 0 : index
    %123 = vector.load %arg1[%c2176, %c0_74] : memref<2560x128xf32, #tpu.memory_space<vmem>>, vector<256x128xf32>
    %cst_75 = arith.constant dense<0.000000e+00> : vector<8x128xf32>
    %124 = tpu.matmul %122, %123, %cst_75 {dimension_numbers = #tpu.dot_dimension_numbers<[1], [0], [0], [1], [0, 0, 1, 1], [], []>} : vector<8x256xf32>, vector<256x128xf32>, vector<8x128xf32> -> vector<8x128xf32>
    %c13 = arith.constant 13 : index
    %c0_76 = arith.constant 0 : index
    %125 = vector.load %arg3[%c13, %c0_76] : memref<16x128xf32, #tpu.memory_space<vmem>>, vector<1x128xf32>
    %126 = vector.broadcast %125 : vector<1x128xf32> to vector<8x128xf32>
    %127 = arith.addf %124, %126 : vector<8x128xf32>
    %cst_77 = arith.constant 0.000000e+00 : f32
    %128 = vector.broadcast %cst_77 : f32 to vector<8x128xf32>
    %129 = arith.maximumf %127, %128 : vector<8x128xf32>
    %c2432 = arith.constant 2432 : index
    %c0_78 = arith.constant 0 : index
    %130 = vector.load %arg1[%c2432, %c0_78] : memref<2560x128xf32, #tpu.memory_space<vmem>>, vector<128x128xf32>
    %cst_79 = arith.constant dense<0.000000e+00> : vector<8x128xf32>
    %131 = tpu.matmul %129, %130, %cst_79 {dimension_numbers = #tpu.dot_dimension_numbers<[1], [0], [0], [1], [0, 0, 1, 1], [], []>} : vector<8x128xf32>, vector<128x128xf32>, vector<8x128xf32> -> vector<8x128xf32>
    %c14 = arith.constant 14 : index
    %c0_80 = arith.constant 0 : index
    %132 = vector.load %arg3[%c14, %c0_80] : memref<16x128xf32, #tpu.memory_space<vmem>>, vector<1x128xf32>
    %133 = vector.broadcast %132 : vector<1x128xf32> to vector<8x128xf32>
    %134 = arith.addf %131, %133 : vector<8x128xf32>
    %135 = arith.negf %134 : vector<8x128xf32>
    %136 = math.exp %135 : vector<8x128xf32>
    %cst_81 = arith.constant 1.000000e+00 : f32
    %137 = vector.broadcast %cst_81 : f32 to vector<8x128xf32>
    %138 = arith.addf %137, %136 : vector<8x128xf32>
    %139 = arith.divf %137, %138 : vector<8x128xf32>
    %c0_82 = arith.constant 0 : index
    %c0_83 = arith.constant 0 : index
    %140 = vector.load %arg5[%c0_82, %c0_83] : memref<8x640xf32, #tpu.memory_space<vmem>>, vector<8x128xf32>
    tpu.vector_store %arg5[%c0_82, %c0_83], %55 {strides = array<i32>} : memref<8x640xf32, #tpu.memory_space<vmem>>, vector<8x128xf32>,
    %c0_84 = arith.constant 0 : index
    %c128_85 = arith.constant 128 : index
    %141 = vector.load %arg5[%c0_84, %c128_85] : memref<8x640xf32, #tpu.memory_space<vmem>>, vector<8x128xf32>
    tpu.vector_store %arg5[%c0_84, %c128_85], %139 {strides = array<i32>} : memref<8x640xf32, #tpu.memory_space<vmem>>, vector<8x128xf32>,
    %c0_86 = arith.constant 0 : index
    %c256_87 = arith.constant 256 : index
    %142 = vector.load %arg5[%c0_86, %c256_87] : memref<8x640xf32, #tpu.memory_space<vmem>>, vector<8x128xf32>
    tpu.vector_store %arg5[%c0_86, %c256_87], %86 {strides = array<i32>} : memref<8x640xf32, #tpu.memory_space<vmem>>, vector<8x128xf32>,
    %c0_88 = arith.constant 0 : index
    %c384_89 = arith.constant 384 : index
    %143 = vector.load %arg5[%c0_88, %c384_89] : memref<8x640xf32, #tpu.memory_space<vmem>>, vector<8x128xf32>
    tpu.vector_store %arg5[%c0_88, %c384_89], %21 {strides = array<i32>} : memref<8x640xf32, #tpu.memory_space<vmem>>, vector<8x128xf32>,
    %c0_90 = arith.constant 0 : index
    %c512_91 = arith.constant 512 : index
    %144 = vector.load %arg5[%c0_90, %c512_91] : memref<8x640xf32, #tpu.memory_space<vmem>>, vector<8x128xf32>
    tpu.vector_store %arg5[%c0_90, %c512_91], %26 {strides = array<i32>} : memref<8x640xf32, #tpu.memory_space<vmem>>, vector<8x128xf32>,
    return
  }
}

</mosaic_0001>

<bundles_post_ra>
// kernel: _forward_arrays.1
= control target key start
LH: loop header
LB: loop body
LE: loop exit
PB: predicated region body
PF: predicated region fallthrough
CT: control target
= control target key end

     0   :  { %10 = vsyncpa [#allocation3], 0  ;;  %s3489_s0 = inlined_call_operand.vmem [shape: f32[8,512], index: 0, kind: input, shape index: {}]   ;;  %s3490_s1 = inlined_call_operand.hbm [shape: f32[2560,128], index: 1, kind: input, shape index: {}]   ;;  %s3491_s2 = inlined_call_operand.hbm [shape: f32[384,256], index: 2, kind: input, shape index: {}]   ;;  %s3492_s3 = inlined_call_operand.hbm [shape: f32[16,128], index: 3, kind: input, shape index: {}]   ;;  %s3493_s4 = inlined_call_operand.hbm [shape: f32[8,256], index: 4, kind: input, shape index: {}]   ;;  %s3494_s5 = inlined_call_operand.vmem [shape: f32[8,640], index: 5, kind: output, shape index: {}]  }
   0x1   :  { %11 = vsyncpa [#allocation5], 0 }
   0x2   :  { %12 = vsyncpa [#allocation8], 0  ;;  %s3250_s18 = smov [#allocation4]   ;;  %s3156_s22 = scalar_lea.hbm %s3491_s2, 12288 }
   0x3   :  { %s32_s19 = sshll.u32 %s3250_s18, 4  ;;  %p3157_p0 = scmp.ne.s32.totalorder %s3491_s2, %s3156_s22  ;;  %s33_s19 = int_to_ptr.vmem [resolvable:$true] %s32_s19 }
   0x4   :  { %p3160_p1 = scmp.lt.u32.totalorder %s3156_s22, %s3491_s2 }
   0x6   :  { %p3162_p2 = pnand %p3160_p1, %p3157_p0 }
   0x8   :  { %3165 = shalt.err (!%p3162_p2)
}
   0x9   :  { %s3166_s27 = scalar_lea.vmem %s33_s19, 12288  ;;  %p3171_p4 = scmp.lt.s32.totalorder %s33_s19, %s33_s19 }
   0xa   :  { %p3167_p3 = scmp.ne.s32.totalorder %s33_s19, %s3166_s27  ;;  %p3172_p5 = scmp.lt.s32.totalorder %s3166_s27, %s3166_s27 }
   0xc   :  { %p3173_p6 = por %p3172_p5, %p3171_p4 }
   0xe   :  { %p3174_p7 = pnand %p3173_p6, %p3167_p3 }
  0x10   :  { %3177 = shalt.err (!%p3174_p7)
}
  0x11   :  { %s3251_s28 = smov 256   ;;  %s3252_s29 = smov 16  }
  0x12   :  { %38 = dma.hbm_to_vmem [thread:$0]  %s3491_s2, 12288, %s33_s19, [#allocation5], %s3251_s28, %s3251_s28, %s3252_s29  }
  0x13   :  { %s3253_s7 = smov [#allocation2]   ;;  %s3178_s11 = scalar_lea.hbm %s3490_s1, 40960 }
  0x14   :  { %s20_s8 = sshll.u32 %s3253_s7, 4  ;;  %p3179_p8 = scmp.ne.s32.totalorder %s3490_s1, %s3178_s11  ;;  %s21_s8 = int_to_ptr.vmem [resolvable:$true] %s20_s8 }
  0x15   :  { %p3182_p9 = scmp.lt.u32.totalorder %s3178_s11, %s3490_s1 }
  0x17   :  { %p3184_p10 = pnand %p3182_p9, %p3179_p8 }
  0x19   :  { %3187 = shalt.err (!%p3184_p10)
}
  0x1a   :  { %s3188_s16 = scalar_lea.vmem %s21_s8, 40960  ;;  %p3193_p12 = scmp.lt.s32.totalorder %s21_s8, %s21_s8 }
  0x1b   :  { %p3189_p11 = scmp.ne.s32.totalorder %s21_s8, %s3188_s16  ;;  %p3194_p13 = scmp.lt.s32.totalorder %s3188_s16, %s3188_s16 }
  0x1d   :  { %p3195_p0 = por %p3194_p13, %p3193_p12 }
  0x1f   :  { %p3196_p1 = pnand %p3195_p0, %p3189_p11 }
  0x21   :  { %3199 = shalt.err (!%p3196_p1)
}
  0x22   :  { %s3254_s2 = smov 128   ;;  %s3255_s17 = smov 8  }
  0x23   :  { %26 = dma.hbm_to_vmem [thread:$0]  %s3490_s1, 40960, %s21_s8, [#allocation3], %s3254_s2, %s3254_s2, %s3255_s17  }
  0x24   :  { %s3256_s20 = smov [#allocation6]   ;;  %s3257_s22 = smov [#allocation7]  }
  0x25   :  { %s44_s21 = sshll.u32 %s3256_s20, 4  ;;  %s57_s23 = sshll.u32 %s3257_s22, 4  ;;  %s45_s21 = int_to_ptr.vmem [resolvable:$true] %s44_s21  ;;  %s58_s23 = int_to_ptr.vmem [resolvable:$true] %s57_s23 }
  0x26   :  { %s3200_s26 = scalar_lea.hbm %s3492_s3, 256 }
  0x27   :  { %p3201_p2 = scmp.ne.s32.totalorder %s3492_s3, %s3200_s26  ;;  %p3204_p3 = scmp.lt.u32.totalorder %s3200_s26, %s3492_s3 }
  0x29   :  { %p3206_p4 = pnand %p3204_p3, %p3201_p2 }
  0x2b   :  { %3209 = shalt.err (!%p3206_p4)
}
  0x2c   :  { %s3210_s1 = scalar_lea.vmem %s45_s21, 256  ;;  %p3215_p6 = scmp.lt.s32.totalorder %s45_s21, %s45_s21 }
  0x2d   :  { %p3211_p5 = scmp.ne.s32.totalorder %s45_s21, %s3210_s1  ;;  %p3216_p7 = scmp.lt.s32.totalorder %s3210_s1, %s3210_s1 }
  0x2f   :  { %p3217_p8 = por %p3216_p7, %p3215_p6 }
  0x31   :  { %p3218_p9 = pnand %p3217_p8, %p3211_p5 }
  0x33   :  { %3221 = shalt.err (!%p3218_p9)
}
  0x34   :  { %50 = dma.hbm_to_vmem [thread:$0]  %s3492_s3, 256, %s45_s21, [#allocation5], %s3254_s2, %s3254_s2, %s3255_s17  }
  0x35   :  { %s3222_s10 = scalar_lea.hbm %s3493_s4, 256 }
  0x36   :  { %p3223_p10 = scmp.ne.s32.totalorder %s3493_s4, %s3222_s10  ;;  %p3226_p11 = scmp.lt.u32.totalorder %s3222_s10, %s3493_s4 }
  0x38   :  { %p3228_p12 = pnand %p3226_p11, %p3223_p10 }
  0x3a   :  { %3231 = shalt.err (!%p3228_p12)
}
  0x3b   :  { %s3232_s15 = scalar_lea.vmem %s58_s23, 256  ;;  %p3237_p0 = scmp.lt.s32.totalorder %s58_s23, %s58_s23 }
  0x3c   :  { %p3233_p13 = scmp.ne.s32.totalorder %s58_s23, %s3232_s15  ;;  %p3238_p1 = scmp.lt.s32.totalorder %s3232_s15, %s3232_s15 }
  0x3e   :  { %p3239_p2 = por %p3238_p1, %p3237_p0 }
  0x40   :  { %p3240_p3 = pnand %p3239_p2, %p3233_p13 }
  0x42   :  { %3243 = shalt.err (!%p3240_p3)
}
  0x43   :  { %60 = dma.hbm_to_vmem [thread:$0]  %s3493_s4, 256, %s58_s23, [#allocation8]  }
  0x44   :  { %3244 = dma.done.wait [#allocation3], 40960  }
  0x45   :  { %3245 = vsyncadd [#allocation3], 4294926336 }
  0x46   :  { %3246 = dma.done.wait [#allocation5], 12544  }
  0x47   :  { %3247 = vsyncadd [#allocation5], 4294954752 }
  0x48   :  { %3248 = dma.done.wait [#allocation8], 256  }
  0x49   :  { %3249 = vsyncadd [#allocation8], 4294967040  ;;  %v3258_v0 = vmov 0.0|0.0   ;;  %v93_v1 = vld [vmem:[#allocation2 + $0x80] sm:$0xff]  ;;  %v94_v2 = vld [vmem:[#allocation2 + $0x88] sm:$0xff]  ;;  %vm3259_vm0 = vmmov 0  }
  0x4a   :  { %2667 = vmatprep.subr.bf16.mxu1 %v3258_v0  ;;  %v77_v3 = vld [vmem:[#allocation2] sm:$0xff]  ;;  %v2635_v4 = vpack.c.bf16 %v94_v2, %v93_v1  ;;  %v78_v5 = vld [vmem:[#allocation2 + $0x8] sm:$0xff]  ;;  %v95_v6 = vld [vmem:[#allocation2 + $0x90] sm:$0xff] }
  0x4b   :  { %v96_v7 = vld [vmem:[#allocation2 + $0x98] sm:$0xff]  ;;  %v2637_v8 = vpack.c.bf16 %v78_v5, %v77_v3  ;;  %v79_v10 = vld [vmem:[#allocation2 + $0x10] sm:$0xff]  ;;  %v97_v12 = vld [vmem:[#allocation2 + $0xa0] sm:$0xff] }
  0x4c   :  { %v2639_v9 = vpack.c.bf16 %v96_v7, %v95_v6  ;;  %v80_v11 = vld [vmem:[#allocation2 + $0x18] sm:$0xff]  ;;  %2636 = vmatprep.subr.bf16.mxu0 %v2635_v4  ;;  %v98_v13 = vld [vmem:[#allocation2 + $0xa8] sm:$0xff]  ;;  %v81_v16 = vld [vmem:[#allocation2 + $0x20] sm:$0xff] }
  0x4d   :  { %2638 = vmatpush3.bf16.msra.mxu0 %v2637_v8  ;;  %v2641_v14 = vpack.c.bf16 %v80_v11, %v79_v10  ;;  %v2643_v15 = vpack.c.bf16 %v98_v13, %v97_v12  ;;  %v82_v17 = vld [vmem:[#allocation2 + $0x28] sm:$0xff]  ;;  %v99_v18 = vld [vmem:[#allocation2 + $0xb0] sm:$0xff]  ;;  %v100_v19 = vld [vmem:[#allocation2 + $0xb8] sm:$0xff]  ;;  %v3260_v12 = vmov 0.0  }
  0x4e   :  { %2640 = vmatprep.subr.bf16.mxu0 %v2639_v9  ;;  %v2645_v20 = vpack.c.bf16 %v82_v17, %v81_v16  ;;  %v2647_v21 = vpack.c.bf16 %v100_v19, %v99_v18  ;;  %v83_v22 = vld [vmem:[#allocation2 + $0x30] sm:$0xff]  ;;  %v84_v23 = vld [vmem:[#allocation2 + $0x38] sm:$0xff]  ;;  %v101_v24 = vld [vmem:[#allocation2 + $0xc0] sm:$0xff]  ;;  %2317 = vmatprep.mubr.msk.f32.mxu1 %vm3259_vm0, %v3260_v12 }
  0x4f   :  { %v102_v25 = vld [vmem:[#allocation2 + $0xc8] sm:$0xff]  ;;  %v185_v27 = vld [vmem:[#allocation2 + $0x100] sm:$0xff]  ;;  %v2649_v29 = vpack.c.bf16 %v84_v23, %v83_v22  ;;  %v187_v31 = vld [vmem:[#allocation2 + $0x110] sm:$0xff] }
  0x50   :  { %v74_v26 = vld [vmem:[%s3489_s0 + $0x8] sm:$0xff]  ;;  %v188_v32 = vld [vmem:[#allocation2 + $0x118] sm:$0xff]  ;;  %v2651_v33 = vpack.c.bf16 %v102_v25, %v101_v24  ;;  %v85_v34 = vld [vmem:[#allocation2 + $0x40] sm:$0xff] }
  0x51   :  { %2642 = vmatpush3.bf16.msra.mxu0 %v2641_v14  ;;  %178 = vmatprep.mubr.f32.mxu0 %v74_v26  ;;  %v186_v28 = vld [vmem:[#allocation2 + $0x108] sm:$0xff]  ;;  %v103_v36 = vld [vmem:[#allocation2 + $0xd0] sm:$0xff]  ;;  %v104_v37 = vld [vmem:[#allocation2 + $0xd8] sm:$0xff]  ;;  %v2671_v38 = vpack.c.bf16 %v188_v32, %v187_v31 }
  0x52   :  { %2644 = vmatprep.subr.bf16.mxu0 %v2643_v15  ;;  %v2668_v30 = vpack.c.bf16 %v186_v28, %v185_v27  ;;  %v86_v35 = vld [vmem:[#allocation2 + $0x48] sm:$0xff]  ;;  %v189_v39 = vld [vmem:[#allocation2 + $0x120] sm:$0xff]  ;;  %v2655_v42 = vpack.c.bf16 %v104_v37, %v103_v36  ;;  %v87_v43 = vld [vmem:[#allocation2 + $0x50] sm:$0xff] }
  0x53   :  { %v190_v40 = vld [vmem:[#allocation2 + $0x128] sm:$0xff]  ;;  %v2653_v41 = vpack.c.bf16 %v86_v35, %v85_v34  ;;  %v88_v44 = vld [vmem:[#allocation2 + $0x58] sm:$0xff]  ;;  %v105_v45 = vld [vmem:[#allocation2 + $0xe0] sm:$0xff] }
  0x54   :  { %2669 = vmatpush3.bf16.msra.mxu1 %v2668_v30  ;;  %v106_v46 = vld [vmem:[#allocation2 + $0xe8] sm:$0xff]  ;;  %v2674_v47 = vpack.c.bf16 %v190_v40, %v189_v39  ;;  %v191_v48 = vld [vmem:[#allocation2 + $0x130] sm:$0xff]  ;;  %v192_v49 = vld [vmem:[#allocation2 + $0x138] sm:$0xff]  ;;  %v2657_v50 = vpack.c.bf16 %v88_v44, %v87_v43 }
  0x55   :  { %2646 = vmatpush3.bf16.msra.mxu0 %v2645_v20  ;;  %2670 = vmatprep.subr.bf16.mxu1 %v3258_v0  ;;  %v2659_v51 = vpack.c.bf16 %v106_v46, %v105_v45  ;;  %v89_v52 = vld [vmem:[#allocation2 + $0x60] sm:$0xff]  ;;  %v90_v53 = vld [vmem:[#allocation2 + $0x68] sm:$0xff]  ;;  %v107_v54 = vld [vmem:[#allocation2 + $0xf0] sm:$0xff]  ;;  %v2677_v56 = vpack.c.bf16 %v192_v49, %v191_v48 }
  0x56   :  { %2648 = vmatprep.subr.bf16.mxu0 %v2647_v21  ;;  %v108_v55 = vld [vmem:[#allocation2 + $0xf8] sm:$0xff]  ;;  %v193_v57 = vld [vmem:[#allocation2 + $0x140] sm:$0xff]  ;;  %v194_v58 = vld [vmem:[#allocation2 + $0x148] sm:$0xff]  ;;  %v2661_v59 = vpack.c.bf16 %v90_v53, %v89_v52 }
  0x57   :  { %v2663_v60 = vpack.c.bf16 %v108_v55, %v107_v54  ;;  %v91_v61 = vld [vmem:[#allocation2 + $0x70] sm:$0xff]  ;;  %v92_v62 = vld [vmem:[#allocation2 + $0x78] sm:$0xff]  ;;  %v2680_v63 = vpack.c.bf16 %v194_v58, %v193_v57  ;;  %v73_v5 = vld [vmem:[%s3489_s0] sm:$0xff] }
  0x58   :  { %2672 = vmatpush3.bf16.msra.mxu1 %v2671_v38  ;;  %v195_v1 = vld [vmem:[#allocation2 + $0x150] sm:$0xff]  ;;  %v196_v2 = vld [vmem:[#allocation2 + $0x158] sm:$0xff]  ;;  %v2665_v3 = vpack.c.bf16 %v92_v62, %v91_v61  ;;  %v197_v6 = vld [vmem:[#allocation2 + $0x160] sm:$0xff] }
  0x59   :  { %2650 = vmatpush3.bf16.msra.mxu0 %v2649_v29  ;;  %2673 = vmatprep.subr.bf16.mxu1 %v3258_v0  ;;  %v2683_v4 = vpack.c.bf16 %v196_v2, %v195_v1  ;;  %v198_v7 = vld [vmem:[#allocation2 + $0x168] sm:$0xff]  ;;  %v199_v9 = vld [vmem:[#allocation2 + $0x170] sm:$0xff]  ;;  %v200_v10 = vld [vmem:[#allocation2 + $0x178] sm:$0xff] }
  0x5a   :  { %2652 = vmatprep.subr.bf16.mxu0 %v2651_v33  ;;  %v2686_v8 = vpack.c.bf16 %v198_v7, %v197_v6  ;;  %v2689_v11 = vpack.c.bf16 %v200_v10, %v199_v9  ;;  %v277_v13 = vld [vmem:[#allocation2 + $0x180] sm:$0xff]  ;;  %v278_v14 = vld [vmem:[#allocation2 + $0x188] sm:$0xff]  ;;  %v279_v16 = vld [vmem:[#allocation2 + $0x190] sm:$0xff] }
  0x5b   :  { %v2692_v15 = vpack.c.bf16 %v278_v14, %v277_v13  ;;  %v280_v17 = vld [vmem:[#allocation2 + $0x198] sm:$0xff]  ;;  %v281_v19 = vld [vmem:[#allocation2 + $0x1a0] sm:$0xff]  ;;  %v282_v20 = vld [vmem:[#allocation2 + $0x1a8] sm:$0xff] }
  0x5c   :  { %2675 = vmatpush3.bf16.msra.mxu1 %v2674_v47  ;;  %v2695_v18 = vpack.c.bf16 %v280_v17, %v279_v16  ;;  %v2698_v21 = vpack.c.bf16 %v282_v20, %v281_v19  ;;  %v283_v22 = vld [vmem:[#allocation2 + $0x1b0] sm:$0xff]  ;;  %v284_v23 = vld [vmem:[#allocation2 + $0x1b8] sm:$0xff]  ;;  %v285_v25 = vld [vmem:[#allocation2 + $0x1c0] sm:$0xff] }
  0x5d   :  { %2654 = vmatpush3.bf16.msra.mxu0 %v2653_v41  ;;  %2676 = vmatprep.subr.bf16.mxu1 %v3258_v0  ;;  %v2701_v24 = vpack.c.bf16 %v284_v23, %v283_v22  ;;  %v286_v26 = vld [vmem:[#allocation2 + $0x1c8] sm:$0xff]  ;;  %v287_v28 = vld [vmem:[#allocation2 + $0x1d0] sm:$0xff]  ;;  %v288_v29 = vld [vmem:[#allocation2 + $0x1d8] sm:$0xff] }
  0x5e   :  { %2656 = vmatprep.subr.bf16.mxu0 %v2655_v42  ;;  %v2704_v27 = vpack.c.bf16 %v286_v26, %v285_v25  ;;  %v2707_v30 = vpack.c.bf16 %v288_v29, %v287_v28  ;;  %v289_v31 = vld [vmem:[#allocation2 + $0x1e0] sm:$0xff]  ;;  %v290_v32 = vld [vmem:[#allocation2 + $0x1e8] sm:$0xff]  ;;  %v370_v43 = vld [vmem:[#allocation2 + $0x210] sm:$0xff] }
  0x5f   :  { %v2710_v33 = vpack.c.bf16 %v290_v32, %v289_v31  ;;  %v1922_v35 = vld [vmem:[#allocation6] ss:$0 sm:$0xff]  ;;  %v369_v39 = vld [vmem:[#allocation2 + $0x208] sm:$0xff]  ;;  %v371_v44 = vld [vmem:[#allocation2 + $0x218] sm:$0xff] }
  0x60   :  { %2678 = vmatpush3.bf16.msra.mxu1 %v2677_v56  ;;  %v368_v38 = vld [vmem:[#allocation2 + $0x200] sm:$0xff]  ;;  %v2719_v45 = vpack.c.bf16 %v371_v44, %v370_v43  ;;  %v373_v47 = vld [vmem:[#allocation2 + $0x228] sm:$0xff]  ;;  %v374_v49 = vld [vmem:[#allocation2 + $0x230] sm:$0xff] }
  0x61   :  { %2658 = vmatpush3.bf16.msra.mxu0 %v2657_v50  ;;  %2679 = vmatprep.subr.bf16.mxu1 %v3258_v0  ;;  %v2716_v41 = vpack.c.bf16 %v369_v39, %v368_v38  ;;  %v372_v46 = vld [vmem:[#allocation2 + $0x220] sm:$0xff]  ;;  %v375_v50 = vld [vmem:[#allocation2 + $0x238] sm:$0xff]  ;;  %v377_v53 = vld [vmem:[#allocation2 + $0x248] sm:$0xff] }
  0x62   :  { %2660 = vmatprep.subr.bf16.mxu0 %v2659_v51  ;;  %v2722_v48 = vpack.c.bf16 %v373_v47, %v372_v46  ;;  %v2725_v51 = vpack.c.bf16 %v375_v50, %v374_v49  ;;  %v376_v52 = vld [vmem:[#allocation2 + $0x240] sm:$0xff]  ;;  %v378_v55 = vld [vmem:[#allocation2 + $0x250] sm:$0xff]  ;;  %v379_v56 = vld [vmem:[#allocation2 + $0x258] sm:$0xff] }
  0x63   :  { %v2728_v54 = vpack.c.bf16 %v377_v53, %v376_v52  ;;  %v2731_v57 = vpack.c.bf16 %v379_v56, %v378_v55  ;;  %v380_v58 = vld [vmem:[#allocation2 + $0x260] sm:$0xff]  ;;  %v291_v61 = vld [vmem:[#allocation2 + $0x1f0] sm:$0xff]  ;;  %v292_v62 = vld [vmem:[#allocation2 + $0x1f8] sm:$0xff] }
  0x64   :  { %2681 = vmatpush3.bf16.msra.mxu1 %v2680_v63  ;;  %v382_v63 = vld [vmem:[#allocation2 + $0x270] sm:$0xff]  ;;  %v2713_v1 = vpack.c.bf16 %v292_v62, %v291_v61  ;;  %v383_v2 = vld [vmem:[#allocation2 + $0x278] sm:$0xff]  ;;  %v465_v6 = vld [vmem:[#allocation2 + $0x288] sm:$0xff] }
  0x65   :  { %2662 = vmatpush3.bf16.msra.mxu0 %v2661_v59  ;;  %2682 = vmatprep.subr.bf16.mxu1 %v3258_v0  ;;  %v381_v59 = vld [vmem:[#allocation2 + $0x268] sm:$0xff]  ;;  %v466_v13 = vld [vmem:[#allocation2 + $0x290] sm:$0xff]  ;;  %v467_v14 = vld [vmem:[#allocation2 + $0x298] sm:$0xff] }
  0x66   :  { %2664 = vmatprep.subr.bf16.mxu0 %v2663_v60  ;;  %v2734_v60 = vpack.c.bf16 %v381_v59, %v380_v58  ;;  %v468_v16 = vld [vmem:[#allocation2 + $0x2a0] sm:$0xff]  ;;  %v469_v17 = vld [vmem:[#allocation2 + $0x2a8] sm:$0xff]  ;;  %v470_v19 = vld [vmem:[#allocation2 + $0x2b0] sm:$0xff] }
  0x67   :  { %v471_v20 = vld [vmem:[#allocation2 + $0x2b8] sm:$0xff]  ;;  %v472_v22 = vld [vmem:[#allocation2 + $0x2c0] sm:$0xff]  ;;  %v473_v23 = vld [vmem:[#allocation2 + $0x2c8] sm:$0xff] }
  0x68   :  { %2684 = vmatpush3.bf16.msra.mxu1 %v2683_v4  ;;  %v1923_v4 = vld [vmem:[#allocation6 + $0x1] ss:$0 sm:$0xff]  ;;  %v474_v25 = vld [vmem:[#allocation2 + $0x2d0] sm:$0xff]  ;;  %v475_v26 = vld [vmem:[#allocation2 + $0x2d8] sm:$0xff] }
  0x69   :  { %2666 = vmatpush3.bf16.msra.mxu0 %v2665_v3  ;;  %2685 = vmatprep.subr.bf16.mxu1 %v3258_v0  ;;  %v2737_v3 = vpack.c.bf16 %v383_v2, %v382_v63  ;;  %v476_v28 = vld [vmem:[#allocation2 + $0x2e0] sm:$0xff]  ;;  %v477_v29 = vld [vmem:[#allocation2 + $0x2e8] sm:$0xff]  ;;  %v478_v31 = vld [vmem:[#allocation2 + $0x2f0] sm:$0xff] }
  0x6a   :  { %2691 = vmatprep.subr.bf16.mxu0 %v3258_v0  ;;  %v479_v32 = vld [vmem:[#allocation2 + $0x2f8] sm:$0xff]  ;;  %v558_v38 = vld [vmem:[#allocation4 + $0x10] sm:$0xff]  ;;  %v561_v39 = vld [vmem:[#allocation4 + $0x28] sm:$0xff] }
  0x6b   :  { %v560_v43 = vld [vmem:[#allocation4 + $0x20] sm:$0xff]  ;;  %v562_v44 = vld [vmem:[#allocation4 + $0x30] sm:$0xff]  ;;  %v567_v46 = vld [vmem:[#allocation4 + $0x58] sm:$0xff] }
  0x6c   :  { %179 = vmatmul.mubr.f32.vlgmr.msra.gmra.mrb[0].mxu0 %v73_v5  ;;  %2687 = vmatpush3.bf16.msra.mxu1 %v2686_v8  ;;  %v464_v5 = vld [vmem:[#allocation2 + $0x280] sm:$0xff]  ;;  %v2769_v47 = vpack.c.bf16 %v562_v44, %v560_v43  ;;  %v566_v50 = vld [vmem:[#allocation4 + $0x50] sm:$0xff]  ;;  %v571_v52 = vld [vmem:[#allocation4 + $0x78] sm:$0xff] }
  0x6d   :  { %2688 = vmatprep.subr.bf16.mxu1 %v3258_v0  ;;  %2352 = vmatprep.mubr.msk.f32.mxu0 %vm3259_vm0, %v3260_v12  ;;  %v2740_v10 = vpack.c.bf16 %v465_v6, %v464_v5  ;;  %v564_v49 = vld [vmem:[#allocation4 + $0x40] sm:$0xff]  ;;  %v570_v56 = vld [vmem:[#allocation4 + $0x70] sm:$0xff]  ;;  %v575_v58 = vld [vmem:[#allocation4 + $0x98] sm:$0xff] }
  0x6e   :  { %2693 = vmatpush3.bf16.msra.mxu0 %v2692_v15  ;;  %v2743_v15 = vpack.c.bf16 %v467_v14, %v466_v13  ;;  %v2773_v53 = vpack.c.bf16 %v566_v50, %v564_v49  ;;  %v568_v55 = vld [vmem:[#allocation4 + $0x60] sm:$0xff]  ;;  %v574_v62 = vld [vmem:[#allocation4 + $0x90] sm:$0xff]  ;;  %v577_v63 = vld [vmem:[#allocation4 + $0xa8] sm:$0xff] }
  0x6f   :  { %2694 = vmatprep.subr.bf16.mxu0 %v3258_v0  ;;  %v2777_v59 = vpack.c.bf16 %v570_v56, %v568_v55  ;;  %v572_v61 = vld [vmem:[#allocation4 + $0x80] sm:$0xff]  ;;  %v578_v5 = vld [vmem:[#allocation4 + $0xb0] sm:$0xff]  ;;  %v581_v6 = vld [vmem:[#allocation4 + $0xc8] sm:$0xff] }
  0x70   :  { %2690 = vmatpush3.bf16.msra.mxu1 %v2689_v11  ;;  %v2781_v2 = vpack.c.bf16 %v574_v62, %v572_v61  ;;  %v1924_v14 = vld [vmem:[#allocation6 + $0x2] ss:$0 sm:$0xff]  ;;  %v691_v43 = vld [vmem:[#allocation2 + $0x390] sm:$0xff]  ;;  %v692_v44 = vld [vmem:[#allocation2 + $0x398] sm:$0xff] }
  0x71   :  { %2715 = vmatprep.subr.bf16.mxu1 %v3258_v0  ;;  %v693_v49 = vld [vmem:[#allocation2 + $0x3a0] sm:$0xff]  ;;  %v694_v50 = vld [vmem:[#allocation2 + $0x3a8] sm:$0xff]  ;;  %v695_v55 = vld [vmem:[#allocation2 + $0x3b0] sm:$0xff] }
  0x72   :  { %2696 = vmatpush3.bf16.msra.mxu0 %v2695_v18  ;;  %v2746_v18 = vpack.c.bf16 %v469_v17, %v468_v16  ;;  %v696_v56 = vld [vmem:[#allocation2 + $0x3b8] sm:$0xff]  ;;  %v697_v61 = vld [vmem:[#allocation2 + $0x3c0] sm:$0xff]  ;;  %v698_v62 = vld [vmem:[#allocation2 + $0x3c8] sm:$0xff] }
  0x73   :  { %2697 = vmatprep.subr.bf16.mxu0 %v3258_v0 }
  0x76   :  { %2699 = vmatpush3.bf16.msra.mxu0 %v2698_v21  ;;  %v2749_v21 = vpack.c.bf16 %v471_v20, %v470_v19 }
  0x77   :  { %2700 = vmatprep.subr.bf16.mxu0 %v3258_v0 }
  0x7a   :  { %2702 = vmatpush3.bf16.msra.mxu0 %v2701_v24  ;;  %v2752_v24 = vpack.c.bf16 %v473_v23, %v472_v22 }
  0x7b   :  { %2703 = vmatprep.subr.bf16.mxu0 %v3258_v0 }
  0x7e   :  { %2705 = vmatpush3.bf16.msra.mxu0 %v2704_v27  ;;  %v2755_v27 = vpack.c.bf16 %v475_v26, %v474_v25 }
  0x7f   :  { %2706 = vmatprep.subr.bf16.mxu0 %v3258_v0 }
  0x82   :  { %2708 = vmatpush3.bf16.msra.mxu0 %v2707_v30  ;;  %v2758_v30 = vpack.c.bf16 %v477_v29, %v476_v28  ;;  %v585_v28 = vld [vmem:[#allocation4 + $0xe8] sm:$0xff]  ;;  %v587_v29 = vld [vmem:[#allocation4 + $0xf8] sm:$0xff] }
  0x83   :  { %2709 = vmatprep.subr.bf16.mxu0 %v3258_v0 }
  0x86   :  { %2711 = vmatpush3.bf16.msra.mxu0 %v2710_v33  ;;  %v2761_v33 = vpack.c.bf16 %v479_v32, %v478_v31  ;;  %v584_v31 = vld [vmem:[#allocation4 + $0xe0] sm:$0xff]  ;;  %v586_v32 = vld [vmem:[#allocation4 + $0xf0] sm:$0xff] }
  0x87   :  { %2712 = vmatprep.subr.bf16.mxu0 %v3258_v0 }
  0x8a   :  { %2714 = vmatpush3.bf16.msra.mxu0 %v2713_v1  ;;  %v579_v1 = vld [vmem:[#allocation4 + $0xb8] sm:$0xff] }
  0x8b   :  { %2739 = vmatprep.subr.bf16.mxu0 %v3258_v0 }
 0x13f   :  { %v1972_v34 = vpop.f32.mrb[0].mxu0 }
 0x140   :  { %v1973_v36 = vpop.f32.mrb[1].mxu0 }
 0x141   :  { %v1974_v37 = vadd.f32 %v1973_v36, %v1972_v34  ;;  %v557_v34 = vld [vmem:[#allocation4 + $0x8] sm:$0xff]  ;;  %v556_v36 = vld [vmem:[#allocation4] sm:$0xff] }
 0x143   :  { %v181_v40 = vadd.f32 %v1974_v37, %v1922_v35  ;;  %v559_v35 = vld [vmem:[#allocation4 + $0x18] sm:$0xff] }
 0x144   :  { %v2763_v37 = vpack.c.bf16 %v559_v35, %v557_v34  ;;  %v689_v34 = vld [vmem:[#allocation2 + $0x380] sm:$0xff]  ;;  %v690_v35 = vld [vmem:[#allocation2 + $0x388] sm:$0xff] }
 0x145   :  { %v184_v42 = vmax.f32 %v181_v40, 0.0  ;;  %v563_v40 = vld [vmem:[#allocation4 + $0x38] sm:$0xff] }
 0x147   :  { %2318 = vmatmul.mubr.f32.vlgmr.msra.gmra.mrb[0].mxu1 %v184_v42  ;;  %v2767_v42 = vpack.c.bf16 %v563_v40, %v561_v39  ;;  %v673_v39 = vld [vmem:[#allocation2 + $0x300] sm:$0xff]  ;;  %v674_v40 = vld [vmem:[#allocation2 + $0x308] sm:$0xff] }
 0x148   :  { %2717 = vmatpush3.bf16.msra.mxu1 %v2716_v41  ;;  %2387 = vmatprep.mubr.msk.f32.mxu1 %vm3259_vm0, %v3260_v12  ;;  %v2765_v41 = vpack.c.bf16 %v558_v38, %v556_v36  ;;  %v802_v36 = vld [vmem:[#allocation2 + $0x480] sm:$0xff]  ;;  %v803_v38 = vld [vmem:[#allocation2 + $0x488] sm:$0xff] }
 0x149   :  { %2718 = vmatprep.subr.bf16.mxu1 %v3258_v0 }
 0x14c   :  { %2720 = vmatpush3.bf16.msra.mxu1 %v2719_v45  ;;  %v565_v45 = vld [vmem:[#allocation4 + $0x48] sm:$0xff] }
 0x14d   :  { %2721 = vmatprep.subr.bf16.mxu1 %v3258_v0 }
 0x150   :  { %2723 = vmatpush3.bf16.msra.mxu1 %v2722_v48  ;;  %v2771_v48 = vpack.c.bf16 %v567_v46, %v565_v45  ;;  %v2799_v45 = vpack.c.bf16 %v692_v44, %v691_v43  ;;  %v675_v46 = vld [vmem:[#allocation2 + $0x310] sm:$0xff]  ;;  %v794_v43 = vld [vmem:[#allocation2 + $0x440] sm:$0xff]  ;;  %v795_v44 = vld [vmem:[#allocation2 + $0x448] sm:$0xff] }
 0x151   :  { %2724 = vmatprep.subr.bf16.mxu1 %v3258_v0 }
 0x154   :  { %2726 = vmatpush3.bf16.msra.mxu1 %v2725_v51  ;;  %v569_v51 = vld [vmem:[#allocation4 + $0x68] sm:$0xff] }
 0x155   :  { %2727 = vmatprep.subr.bf16.mxu1 %v3258_v0 }
 0x158   :  { %2729 = vmatpush3.bf16.msra.mxu1 %v2728_v54  ;;  %v2775_v54 = vpack.c.bf16 %v571_v52, %v569_v51  ;;  %v2803_v51 = vpack.c.bf16 %v694_v50, %v693_v49  ;;  %v677_v52 = vld [vmem:[#allocation2 + $0x320] sm:$0xff]  ;;  %v796_v49 = vld [vmem:[#allocation2 + $0x450] sm:$0xff]  ;;  %v797_v50 = vld [vmem:[#allocation2 + $0x458] sm:$0xff] }
 0x159   :  { %2730 = vmatprep.subr.bf16.mxu1 %v3258_v0 }
 0x15c   :  { %2732 = vmatpush3.bf16.msra.mxu1 %v2731_v57  ;;  %v573_v57 = vld [vmem:[#allocation4 + $0x88] sm:$0xff] }
 0x15d   :  { %2733 = vmatprep.subr.bf16.mxu1 %v3258_v0 }
 0x160   :  { %2735 = vmatpush3.bf16.msra.mxu1 %v2734_v60  ;;  %v2779_v60 = vpack.c.bf16 %v575_v58, %v573_v57  ;;  %v2807_v57 = vpack.c.bf16 %v696_v56, %v695_v55  ;;  %v679_v58 = vld [vmem:[#allocation2 + $0x330] sm:$0xff]  ;;  %v685_v55 = vld [vmem:[#allocation2 + $0x360] sm:$0xff]  ;;  %v686_v56 = vld [vmem:[#allocation2 + $0x368] sm:$0xff] }
 0x161   :  { %2736 = vmatprep.subr.bf16.mxu1 %v3258_v0 }
 0x164   :  { %2738 = vmatpush3.bf16.msra.mxu1 %v2737_v3  ;;  %v2783_v3 = vpack.c.bf16 %v579_v1, %v577_v63  ;;  %v2811_v63 = vpack.c.bf16 %v698_v62, %v697_v61  ;;  %v681_v1 = vld [vmem:[#allocation2 + $0x340] sm:$0xff]  ;;  %v703_v61 = vld [vmem:[#allocation2 + $0x3f0] sm:$0xff]  ;;  %v704_v62 = vld [vmem:[#allocation2 + $0x3f8] sm:$0xff] }
 0x165   :  { %2764 = vmatprep.subr.bf16.mxu1 %v2763_v37  ;;  %v2795_v37 = vpack.c.bf16 %v690_v35, %v689_v34  ;;  %v809_v34 = vld [vmem:[#allocation2 + $0x4b8] sm:$0xff] }
 0x21a   :  { %v272_v7 = vpop.f32.mrb[0].mxu1 }
 0x21b   :  { %v273_v8 = vadd.f32 %v1923_v4, %v272_v7  ;;  %v2319_v9 = vpop.f32.mrb[1].mxu1  ;;  %v576_v4 = vld [vmem:[#allocation4 + $0xa0] sm:$0xff]  ;;  %v583_v7 = vld [vmem:[#allocation4 + $0xd8] sm:$0xff] }
 0x21c   :  { %v2787_v9 = vpack.c.bf16 %v583_v7, %v581_v6  ;;  %v683_v7 = vld [vmem:[#allocation2 + $0x350] sm:$0xff] }
 0x21d   :  { %v276_v11 = vmax.f32 %v273_v8, 0.0  ;;  %v2785_v8 = vpack.c.bf16 %v578_v5, %v576_v4  ;;  %v699_v4 = vld [vmem:[#allocation2 + $0x3d0] sm:$0xff]  ;;  %v700_v5 = vld [vmem:[#allocation2 + $0x3d8] sm:$0xff] }
 0x21e   :  { %v2815_v6 = vpack.c.bf16 %v700_v5, %v699_v4  ;;  %v688_v4 = vld [vmem:[#allocation2 + $0x378] sm:$0xff] }
 0x21f   :  { %2353 = vmatmul.mubr.f32.vlgmr.msra.gmra.mrb[2].mxu0 %v276_v11  ;;  %2388 = vmatmul.mubr.f32.vlgmr.msra.gmra.mrb[2].mxu1 %v276_v11  ;;  %v582_v11 = vld [vmem:[#allocation4 + $0xd0] sm:$0xff] }
 0x220   :  { %2741 = vmatpush3.bf16.msra.mxu0 %v2740_v10  ;;  %2422 = vmatprep.mubr.msk.f32.mxu0 %vm3259_vm0, %v3260_v12  ;;  %v580_v10 = vld [vmem:[#allocation4 + $0xc0] sm:$0xff] }
 0x221   :  { %2742 = vmatprep.subr.bf16.mxu0 %v3258_v0  ;;  %664 = vmatprep.mubr.f32.mxu1 %v3260_v12  ;;  %v2789_v13 = vpack.c.bf16 %v582_v11, %v580_v10  ;;  %v701_v10 = vld [vmem:[#allocation2 + $0x3e0] sm:$0xff]  ;;  %v702_v11 = vld [vmem:[#allocation2 + $0x3e8] sm:$0xff] }
 0x222   :  { %2766 = vmatpush1.bf16.msra.mxu1 %v2765_v41  ;;  %v2827_v41 = vpack.c.bf16 %v803_v38, %v802_v36  ;;  %v793_v38 = vld [vmem:[#allocation2 + $0x438] sm:$0xff] }
 0x223   :  { %2768 = vmatprep.subr.bf16.mxu1 %v2767_v42  ;;  %v2797_v42 = vpack.c.bf16 %v674_v40, %v673_v39  ;;  %v810_v39 = vld [vmem:[#allocation2 + $0x4c0] sm:$0xff]  ;;  %v811_v40 = vld [vmem:[#allocation2 + $0x4c8] sm:$0xff] }
 0x224   :  { %2744 = vmatpush3.bf16.msra.mxu0 %v2743_v15  ;;  %v1925_v15 = vld [vmem:[#allocation6 + $0x3] ss:$0 sm:$0xff] }
 0x225   :  { %2745 = vmatprep.subr.bf16.mxu0 %v3258_v0 }
 0x226   :  { %2770 = vmatpush1.bf16.msra.mxu1 %v2769_v47  ;;  %v676_v47 = vld [vmem:[#allocation2 + $0x318] sm:$0xff] }
 0x227   :  { %2772 = vmatprep.subr.bf16.mxu1 %v2771_v48  ;;  %v2801_v48 = vpack.c.bf16 %v676_v47, %v675_v46  ;;  %v813_v46 = vld [vmem:[#allocation2 + $0x4d8] sm:$0xff]  ;;  %v2845_v47 = vpack.c.bf16 %v795_v44, %v794_v43  ;;  %v907_v43 = vld [vmem:[#allocation2 + $0x568] sm:$0xff] }
 0x228   :  { %2747 = vmatpush3.bf16.msra.mxu0 %v2746_v18 }
 0x229   :  { %2748 = vmatprep.subr.bf16.mxu0 %v3258_v0 }
 0x22a   :  { %2774 = vmatpush1.bf16.msra.mxu1 %v2773_v53  ;;  %v678_v53 = vld [vmem:[#allocation2 + $0x328] sm:$0xff] }
 0x22b   :  { %2776 = vmatprep.subr.bf16.mxu1 %v2775_v54  ;;  %v2805_v54 = vpack.c.bf16 %v678_v53, %v677_v52  ;;  %v815_v52 = vld [vmem:[#allocation2 + $0x4e8] sm:$0xff]  ;;  %v2849_v53 = vpack.c.bf16 %v797_v50, %v796_v49  ;;  %v988_v50 = vld [vmem:[#allocation2 + $0x590] sm:$0xff] }
 0x22c   :  { %2750 = vmatpush3.bf16.msra.mxu0 %v2749_v21  ;;  %v987_v49 = vld [vmem:[#allocation2 + $0x588] sm:$0xff] }
 0x22d   :  { %2751 = vmatprep.subr.bf16.mxu0 %v3258_v0 }
 0x22e   :  { %2778 = vmatpush1.bf16.msra.mxu1 %v2777_v59  ;;  %v680_v59 = vld [vmem:[#allocation2 + $0x338] sm:$0xff] }
 0x22f   :  { %2780 = vmatprep.subr.bf16.mxu1 %v2779_v60  ;;  %v2809_v60 = vpack.c.bf16 %v680_v59, %v679_v58  ;;  %v2821_v58 = vpack.c.bf16 %v686_v56, %v685_v55  ;;  %v799_v59 = vld [vmem:[#allocation2 + $0x468] sm:$0xff] }
 0x230   :  { %2753 = vmatpush3.bf16.msra.mxu0 %v2752_v24  ;;  %v75_v24 = vld [vmem:[%s3489_s0 + $0x10] sm:$0xff]  ;;  %v991_v55 = vld [vmem:[#allocation2 + $0x5a8] sm:$0xff] }
 0x231   :  { %2754 = vmatprep.subr.bf16.mxu0 %v3258_v0 }
 0x232   :  { %2782 = vmatpush1.bf16.msra.mxu1 %v2781_v2  ;;  %v682_v2 = vld [vmem:[#allocation2 + $0x348] sm:$0xff] }
 0x233   :  { %2784 = vmatprep.subr.bf16.mxu1 %v2783_v3  ;;  %v2813_v3 = vpack.c.bf16 %v682_v2, %v681_v1  ;;  %v2823_v1 = vpack.c.bf16 %v704_v62, %v703_v61  ;;  %v817_v2 = vld [vmem:[#allocation2 + $0x4f8] sm:$0xff]  ;;  %v995_v61 = vld [vmem:[#allocation2 + $0x5c8] sm:$0xff] }
 0x234   :  { %2756 = vmatpush3.bf16.msra.mxu0 %v2755_v27 }
 0x235   :  { %2757 = vmatprep.subr.bf16.mxu0 %v3258_v0 }
 0x236   :  { %2786 = vmatpush1.bf16.msra.mxu1 %v2785_v8  ;;  %v684_v8 = vld [vmem:[#allocation2 + $0x358] sm:$0xff] }
 0x237   :  { %2788 = vmatprep.subr.bf16.mxu1 %v2787_v9  ;;  %v2817_v9 = vpack.c.bf16 %v684_v8, %v683_v7  ;;  %v800_v7 = vld [vmem:[#allocation2 + $0x470] sm:$0xff]  ;;  %v801_v8 = vld [vmem:[#allocation2 + $0x478] sm:$0xff] }
 0x238   :  { %2759 = vmatpush3.bf16.msra.mxu0 %v2758_v30  ;;  %v2791_v30 = vpack.c.bf16 %v587_v29, %v585_v28  ;;  %v807_v28 = vld [vmem:[#allocation2 + $0x4a8] sm:$0xff] }
 0x239   :  { %2760 = vmatprep.subr.bf16.mxu0 %v3258_v0 }
 0x23a   :  { %2790 = vmatpush1.bf16.msra.mxu1 %v2789_v13  ;;  %v2819_v13 = vpack.c.bf16 %v702_v11, %v701_v10  ;;  %v590_v10 = vlaneseq }
 0x23b   :  { %2792 = vmatprep.subr.bf16.mxu1 %v2791_v30 }
 0x23c   :  { %2762 = vmatpush3.bf16.msra.mxu0 %v2761_v33  ;;  %v2793_v33 = vpack.c.bf16 %v586_v32, %v584_v31  ;;  %v790_v31 = vld [vmem:[#allocation2 + $0x420] sm:$0xff]  ;;  %v791_v32 = vld [vmem:[#allocation2 + $0x428] sm:$0xff]  ;;  %v591_v11 = vshrl.u32 %v590_v10, 7 }
 0x23d   :  { %2796 = vmatprep.subr.bf16.mxu0 %v2795_v37  ;;  %v2837_v35 = vpack.c.bf16 %v791_v32, %v790_v31  ;;  %v792_v37 = vld [vmem:[#allocation2 + $0x430] sm:$0xff]  ;;  %v899_v31 = vld [vmem:[#allocation2 + $0x528] sm:$0xff]  ;;  %v1929_v10 = vld [vmem:[#allocation6 + $0x6] ss:$0 sm:$0xff] }
 0x23e   :  { %2794 = vmatpush1.bf16.msra.mxu1 %v2793_v33  ;;  %v808_v33 = vld [vmem:[#allocation2 + $0x4b0] sm:$0xff] }
 0x23f   :  { %2828 = vmatprep.subr.bf16.mxu1 %v2827_v41  ;;  %v2839_v36 = vpack.c.bf16 %v809_v34, %v808_v33  ;;  %v2841_v41 = vpack.c.bf16 %v793_v38, %v792_v37  ;;  %v900_v33 = vld [vmem:[#allocation2 + $0x530] sm:$0xff]  ;;  %v901_v34 = vld [vmem:[#allocation2 + $0x538] sm:$0xff]  ;;  %v903_v37 = vld [vmem:[#allocation2 + $0x548] sm:$0xff] }
 0x2f2   :  { %v364_v16 = vpop.f32.mrb[2].mxu0  ;;  %v455_v17 = vpop.f32.mrb[2].mxu1 }
 0x2f3   :  { %v365_v18 = vadd.f32 %v1924_v14, %v364_v16  ;;  %v456_v19 = vadd.f32 %v1925_v15, %v455_v17  ;;  %v2354_v20 = vpop.f32.mrb[3].mxu0  ;;  %v2389_v21 = vpop.f32.mrb[3].mxu1  ;;  %v1926_v14 = vld [vmem:[#allocation6 + $0x4] ss:$0 sm:$0xff]  ;;  %v787_v16 = vld [vmem:[#allocation2 + $0x408] sm:$0xff] }
 0x2f4   :  { %v786_v15 = vld [vmem:[#allocation2 + $0x400] sm:$0xff] }
 0x2f5   :  { %1913 = vst [vmem:[%s3494_s5 + $0x18] sm:$0xff] %v365_v18  ;;  %v459_v22 = vmul.f32 0.5, %v456_v19  ;;  %1914 = vst [vmem:[%s3494_s5 + $0x20] sm:$0xff] %v456_v19  ;;  %v805_v19 = vld [vmem:[#allocation2 + $0x498] sm:$0xff] }
 0x2f7   :  { %v460_v23 = vmul.f32 1.442695, %v459_v22  ;;  %v2829_v22 = vpack.c.bf16 %v787_v16, %v786_v15  ;;  %v3399_v15 = vsub.s32 1, %v591_v11 }
 0x2f9   :  { %3142 = vpow2.f32 %v460_v23 }
 0x303   :  { %v3143_v25 = vpop.eup %3142 }
 0x304   :  { %v462_v26 = vmul.f32 %v3143_v25, %v75_v24  ;;  %v788_v25 = vld [vmem:[#allocation2 + $0x410] sm:$0xff] }
 0x306   :  { %v463_v27 = vadd.f32 %v462_v26, %v365_v18  ;;  %v804_v18 = vld [vmem:[#allocation2 + $0x490] sm:$0xff]  ;;  %v789_v26 = vld [vmem:[#allocation2 + $0x418] sm:$0xff] }
 0x307   :  { %v2831_v24 = vpack.c.bf16 %v805_v19, %v804_v18  ;;  %v2833_v29 = vpack.c.bf16 %v789_v26, %v788_v25 }
 0x308   :  { %2423 = vmatmul.mubr.f32.vlgmr.msra.gmra.mrb[4].mxu0 %v463_v27  ;;  %v806_v27 = vld [vmem:[#allocation2 + $0x4a0] sm:$0xff] }
 0x309   :  { %2798 = vmatpush3.bf16.msra.mxu0 %v2797_v42  ;;  %v2835_v30 = vpack.c.bf16 %v807_v28, %v806_v27  ;;  %v2843_v42 = vpack.c.bf16 %v811_v40, %v810_v39  ;;  %v896_v27 = vld [vmem:[#allocation2 + $0x510] sm:$0xff]  ;;  %v897_v28 = vld [vmem:[#allocation2 + $0x518] sm:$0xff] }
 0x30a   :  { %2800 = vmatprep.subr.bf16.mxu0 %v2799_v45  ;;  %v812_v45 = vld [vmem:[#allocation2 + $0x4d0] sm:$0xff]  ;;  %v905_v40 = vld [vmem:[#allocation2 + $0x558] sm:$0xff] }
 0x30b   :  { %v904_v39 = vld [vmem:[#allocation2 + $0x550] sm:$0xff] }
 0x30d   :  { %2802 = vmatpush3.bf16.msra.mxu0 %v2801_v48  ;;  %v2847_v48 = vpack.c.bf16 %v813_v46, %v812_v45  ;;  %v908_v45 = vld [vmem:[#allocation2 + $0x570] sm:$0xff]  ;;  %v909_v46 = vld [vmem:[#allocation2 + $0x578] sm:$0xff] }
 0x30e   :  { %2804 = vmatprep.subr.bf16.mxu0 %v2803_v51  ;;  %v814_v51 = vld [vmem:[#allocation2 + $0x4e0] sm:$0xff] }
 0x311   :  { %2806 = vmatpush3.bf16.msra.mxu0 %v2805_v54  ;;  %v2851_v54 = vpack.c.bf16 %v815_v52, %v814_v51  ;;  %v989_v52 = vld [vmem:[#allocation2 + $0x598] sm:$0xff] }
 0x312   :  { %2808 = vmatprep.subr.bf16.mxu0 %v2807_v57  ;;  %v798_v57 = vld [vmem:[#allocation2 + $0x460] sm:$0xff] }
 0x315   :  { %2810 = vmatpush3.bf16.msra.mxu0 %v2809_v60  ;;  %v2853_v60 = vpack.c.bf16 %v799_v59, %v798_v57  ;;  %v992_v57 = vld [vmem:[#allocation2 + $0x5b0] sm:$0xff] }
 0x316   :  { %2812 = vmatprep.subr.bf16.mxu0 %v2811_v63  ;;  %v816_v63 = vld [vmem:[#allocation2 + $0x4f0] sm:$0xff] }
 0x317   :  { %v2855_v5 = vpack.c.bf16 %v817_v2, %v816_v63  ;;  %v996_v63 = vld [vmem:[#allocation2 + $0x5d0] sm:$0xff] }
 0x319   :  { %2814 = vmatpush3.bf16.msra.mxu0 %v2813_v3  ;;  %v687_v3 = vld [vmem:[#allocation2 + $0x370] sm:$0xff] }
 0x31a   :  { %2816 = vmatprep.subr.bf16.mxu0 %v2815_v6  ;;  %v2825_v6 = vpack.c.bf16 %v688_v4, %v687_v3  ;;  %v998_v3 = vld [vmem:[#allocation2 + $0x5e0] sm:$0xff]  ;;  %v999_v4 = vld [vmem:[#allocation2 + $0x5e8] sm:$0xff] }
 0x31d   :  { %2818 = vmatpush3.bf16.msra.mxu0 %v2817_v9  ;;  %v2857_v9 = vpack.c.bf16 %v801_v8, %v800_v7  ;;  %v1927_v8 = vld [vmem:[#allocation6 + $0x5] ss:$0 sm:$0xff] }
 0x31e   :  { %2820 = vmatprep.subr.bf16.mxu0 %v2819_v13  ;;  %v3397_v13 = vsub.s32 0, %v591_v11 }
 0x321   :  { %2822 = vmatpush3.bf16.msra.mxu0 %v2821_v58  ;;  %v993_v58 = vld [vmem:[#allocation2 + $0x5b8] sm:$0xff] }
 0x322   :  { %2824 = vmatprep.subr.bf16.mxu0 %v2823_v1  ;;  %v2893_v59 = vpack.c.bf16 %v993_v58, %v992_v57  ;;  %v997_v1 = vld [vmem:[#allocation2 + $0x5d8] sm:$0xff]  ;;  %v1180_v57 = vld [vmem:[#allocation4 + $0x128] sm:$0xff] }
 0x323   :  { %v2899_v2 = vpack.c.bf16 %v997_v1, %v996_v63  ;;  %v1182_v58 = vld [vmem:[#allocation4 + $0x138] sm:$0xff]  ;;  %v1179_v1 = vld [vmem:[#allocation4 + $0x120] sm:$0xff] }
 0x324   :  { %v2935_v63 = vpack.c.bf16 %v1182_v58, %v1180_v57  ;;  %v1314_v57 = vld [vmem:[#allocation2 + $0x718] sm:$0xff] }
 0x325   :  { %2826 = vmatpush3.bf16.msra.mxu0 %v2825_v6 }
 0x326   :  { %2859 = vmatprep.subr.bf16.mxu0 %v3258_v0 }
 0x3db   :  { %v551_v17 = vpop.f32.mrb[4].mxu0 }
 0x3dc   :  { %v552_v20 = vadd.f32 %v1926_v14, %v551_v17  ;;  %v2424_v21 = vpop.f32.mrb[5].mxu0  ;;  %v588_v14 = vld [vmem:[#allocation7] ss:$8 sm:$0x3] }
 0x3dd   :  { %v593_v16 = vrot.slane %v588_v14, %v3397_v13  ;;  %v597_v17 = vrot.slane %v588_v14, %v3399_v15  ;;  %v894_v21 = vld [vmem:[#allocation2 + $0x500] sm:$0xff] }
 0x3de   :  { %v555_v23 = vmax.f32 %v552_v20, 0.0 }
 0x3e0   :  { %665 = vmatmul.mubr.f32.vlgmr.msra.gmra.mrb[4].mxu1 %v555_v23 }
 0x3e1   :  { %2830 = vmatpush3.bf16.msra.mxu1 %v2829_v22  ;;  %v895_v22 = vld [vmem:[#allocation2 + $0x508] sm:$0xff] }
 0x3e2   :  { %2832 = vmatprep.subr.bf16.mxu1 %v2831_v24  ;;  %v2860_v25 = vpack.c.bf16 %v895_v22, %v894_v21 }
 0x3e5   :  { %2834 = vmatpush3.bf16.msra.mxu1 %v2833_v29  ;;  %v2863_v29 = vpack.c.bf16 %v897_v28, %v896_v27  ;;  %v1001_v27 = vld [vmem:[#allocation2 + $0x5f8] sm:$0xff] }
 0x3e6   :  { %2836 = vmatprep.subr.bf16.mxu1 %v2835_v30  ;;  %v898_v30 = vld [vmem:[#allocation2 + $0x520] sm:$0xff] }
 0x3e7   :  { %v2866_v32 = vpack.c.bf16 %v899_v31, %v898_v30  ;;  %v1178_v30 = vld [vmem:[#allocation4 + $0x118] sm:$0xff] }
 0x3e9   :  { %2838 = vmatpush3.bf16.msra.mxu1 %v2837_v35  ;;  %v2869_v35 = vpack.c.bf16 %v901_v34, %v900_v33  ;;  %v1079_v33 = vld [vmem:[#allocation2 + $0x608] sm:$0xff]  ;;  %v1080_v34 = vld [vmem:[#allocation2 + $0x610] sm:$0xff] }
 0x3ea   :  { %2840 = vmatprep.subr.bf16.mxu1 %v2839_v36  ;;  %v902_v36 = vld [vmem:[#allocation2 + $0x540] sm:$0xff] }
 0x3eb   :  { %v2872_v38 = vpack.c.bf16 %v903_v37, %v902_v36  ;;  %v1081_v36 = vld [vmem:[#allocation2 + $0x618] sm:$0xff] }
 0x3ec   :  { %v2911_v37 = vpack.c.bf16 %v1081_v36, %v1080_v34  ;;  %v1199_v36 = vld [vmem:[#allocation4 + $0x1c0] sm:$0xff] }
 0x3ed   :  { %2842 = vmatpush3.bf16.msra.mxu1 %v2841_v41  ;;  %v2875_v41 = vpack.c.bf16 %v905_v40, %v904_v39  ;;  %v1083_v39 = vld [vmem:[#allocation2 + $0x628] sm:$0xff] }
 0x3ee   :  { %2844 = vmatprep.subr.bf16.mxu1 %v2843_v42  ;;  %v906_v42 = vld [vmem:[#allocation2 + $0x560] sm:$0xff] }
 0x3ef   :  { %v2878_v44 = vpack.c.bf16 %v907_v43, %v906_v42  ;;  %v1085_v42 = vld [vmem:[#allocation2 + $0x638] sm:$0xff] }
 0x3f1   :  { %2846 = vmatpush3.bf16.msra.mxu1 %v2845_v47  ;;  %v2881_v47 = vpack.c.bf16 %v909_v46, %v908_v45  ;;  %v1087_v45 = vld [vmem:[#allocation2 + $0x648] sm:$0xff] }
 0x3f2   :  { %2848 = vmatprep.subr.bf16.mxu1 %v2847_v48  ;;  %v986_v48 = vld [vmem:[#allocation2 + $0x580] sm:$0xff] }
 0x3f3   :  { %v2884_v51 = vpack.c.bf16 %v987_v49, %v986_v48  ;;  %v1089_v48 = vld [vmem:[#allocation2 + $0x658] sm:$0xff] }
 0x3f5   :  { %2850 = vmatpush3.bf16.msra.mxu1 %v2849_v53  ;;  %v2887_v53 = vpack.c.bf16 %v989_v52, %v988_v50  ;;  %v1090_v50 = vld [vmem:[#allocation2 + $0x660] sm:$0xff] }
 0x3f6   :  { %2852 = vmatprep.subr.bf16.mxu1 %v2851_v54  ;;  %v990_v54 = vld [vmem:[#allocation2 + $0x5a0] sm:$0xff] }
 0x3f7   :  { %v2890_v56 = vpack.c.bf16 %v991_v55, %v990_v54  ;;  %v1175_v54 = vld [vmem:[#allocation4 + $0x100] sm:$0xff]  ;;  %v1177_v55 = vld [vmem:[#allocation4 + $0x110] sm:$0xff] }
 0x3f9   :  { %2854 = vmatpush3.bf16.msra.mxu1 %v2853_v60  ;;  %v994_v60 = vld [vmem:[#allocation2 + $0x5c0] sm:$0xff] }
 0x3fa   :  { %2856 = vmatprep.subr.bf16.mxu1 %v2855_v5  ;;  %v2896_v62 = vpack.c.bf16 %v995_v61, %v994_v60  ;;  %v2902_v5 = vpack.c.bf16 %v999_v4, %v998_v3  ;;  %v2933_v61 = vpack.c.bf16 %v1177_v55, %v1175_v54  ;;  %v1184_v3 = vld [vmem:[#allocation4 + $0x148] sm:$0xff]  ;;  %v1186_v4 = vld [vmem:[#allocation4 + $0x158] sm:$0xff] }
 0x3fb   :  { %v1296_v54 = vld [vmem:[#allocation2 + $0x688] sm:$0xff] }
 0x3fd   :  { %2858 = vmatpush3.bf16.msra.mxu1 %v2857_v9 }
 0x3fe   :  { %2883 = vmatprep.subr.bf16.mxu1 %v3258_v0 }
 0x4b3   :  { %v666_v18 = vpop.f32.mrb[4].mxu1 }
 0x4b4   :  { %v667_v19 = vadd.f32 %v666_v18, %v593_v16  ;;  %v668_v20 = vpop.f32.mrb[5].mxu1 }
 0x4b5   :  { %v669_v23 = vadd.f32 %v668_v20, %v597_v17 }
 0x4b6   :  { %v3405_v26 = vmax.f32 %v667_v19, 0.0 }
 0x4b7   :  { %v3403_v24 = vmax.f32 %v669_v23, 0.0 }
 0x4b9   :  { %774 = vmatprep.mubr.f32.mxu0 %v3403_v24  ;;  %887 = vmatprep.mubr.f32.mxu1 %v3403_v24 }
 0x4ba   :  { %775 = vmatmul.mubr.f32.vlgmr.msra.gmra.mrb[6].mxu0 %v3405_v26  ;;  %888 = vmatmul.mubr.f32.vlgmr.msra.gmra.mrb[6].mxu1 %v3405_v26 }
 0x4bb   :  { %2861 = vmatpush3.bf16.msra.mxu0 %v2860_v25  ;;  %2457 = vmatprep.mubr.msk.f32.mxu0 %vm3259_vm0, %v3260_v12  ;;  %v1000_v25 = vld [vmem:[#allocation2 + $0x5f0] sm:$0xff] }
 0x4bc   :  { %2862 = vmatprep.subr.bf16.mxu0 %v3258_v0  ;;  %2492 = vmatprep.mubr.msk.f32.mxu1 %vm3259_vm0, %v3260_v12  ;;  %v2905_v28 = vpack.c.bf16 %v1001_v27, %v1000_v25  ;;  %v1196_v25 = vld [vmem:[#allocation4 + $0x1a8] sm:$0xff]  ;;  %v1198_v27 = vld [vmem:[#allocation4 + $0x1b8] sm:$0xff] }
 0x4bd   :  { %2885 = vmatpush3.bf16.msra.mxu1 %v2884_v51  ;;  %v1091_v51 = vld [vmem:[#allocation2 + $0x668] sm:$0xff] }
 0x4be   :  { %2886 = vmatprep.subr.bf16.mxu1 %v3258_v0  ;;  %v2926_v52 = vpack.c.bf16 %v1091_v51, %v1090_v50  ;;  %v1312_v50 = vld [vmem:[#allocation2 + $0x708] sm:$0xff] }
 0x4bf   :  { %2864 = vmatpush3.bf16.msra.mxu0 %v2863_v29  ;;  %v1176_v29 = vld [vmem:[#allocation4 + $0x108] sm:$0xff] }
 0x4c0   :  { %2865 = vmatprep.subr.bf16.mxu0 %v3258_v0  ;;  %v2931_v31 = vpack.c.bf16 %v1178_v30, %v1176_v29  ;;  %v2951_v29 = vpack.c.bf16 %v1198_v27, %v1196_v25  ;;  %v1195_v30 = vld [vmem:[#allocation4 + $0x1a0] sm:$0xff]  ;;  %v1322_v25 = vld [vmem:[#allocation2 + $0x758] sm:$0xff] }
 0x4c1   :  { %2888 = vmatpush3.bf16.msra.mxu1 %v2887_v53  ;;  %v1930_v53 = vld [vmem:[#allocation6 + $0x7] ss:$0 sm:$0xff] }
 0x4c2   :  { %2889 = vmatprep.subr.bf16.mxu1 %v3258_v0 }
 0x4c3   :  { %2867 = vmatpush3.bf16.msra.mxu0 %v2866_v32  ;;  %v1078_v32 = vld [vmem:[#allocation2 + $0x600] sm:$0xff] }
 0x4c4   :  { %2868 = vmatprep.subr.bf16.mxu0 %v3258_v0 }
 0x4c5   :  { %2891 = vmatpush3.bf16.msra.mxu1 %v2890_v56 }
 0x4c6   :  { %2892 = vmatprep.subr.bf16.mxu1 %v3258_v0 }
 0x4c7   :  { %2870 = vmatpush3.bf16.msra.mxu0 %v2869_v35  ;;  %v2908_v35 = vpack.c.bf16 %v1079_v33, %v1078_v32  ;;  %v1200_v32 = vld [vmem:[#allocation4 + $0x1c8] sm:$0xff]  ;;  %v1202_v33 = vld [vmem:[#allocation4 + $0x1d8] sm:$0xff] }
 0x4c8   :  { %2871 = vmatprep.subr.bf16.mxu0 %v3258_v0 }
 0x4c9   :  { %2894 = vmatpush3.bf16.msra.mxu1 %v2893_v59 }
 0x4ca   :  { %2895 = vmatprep.subr.bf16.mxu1 %v3258_v0 }
 0x4cb   :  { %2873 = vmatpush3.bf16.msra.mxu0 %v2872_v38  ;;  %v1082_v38 = vld [vmem:[#allocation2 + $0x620] sm:$0xff] }
 0x4cc   :  { %2874 = vmatprep.subr.bf16.mxu0 %v3258_v0  ;;  %v2914_v40 = vpack.c.bf16 %v1083_v39, %v1082_v38  ;;  %v1204_v38 = vld [vmem:[#allocation4 + $0x1e8] sm:$0xff]  ;;  %v1206_v39 = vld [vmem:[#allocation4 + $0x1f8] sm:$0xff] }
 0x4cd   :  { %2897 = vmatpush3.bf16.msra.mxu1 %v2896_v62 }
 0x4ce   :  { %2898 = vmatprep.subr.bf16.mxu1 %v3258_v0 }
 0x4cf   :  { %2876 = vmatpush3.bf16.msra.mxu0 %v2875_v41  ;;  %v1084_v41 = vld [vmem:[#allocation2 + $0x630] sm:$0xff] }
 0x4d0   :  { %2877 = vmatprep.subr.bf16.mxu0 %v3258_v0  ;;  %v2917_v43 = vpack.c.bf16 %v1085_v42, %v1084_v41  ;;  %v2959_v41 = vpack.c.bf16 %v1206_v39, %v1204_v38  ;;  %v1203_v42 = vld [vmem:[#allocation4 + $0x1e0] sm:$0xff]  ;;  %v1326_v38 = vld [vmem:[#allocation2 + $0x778] sm:$0xff] }
 0x4d1   :  { %2900 = vmatpush3.bf16.msra.mxu1 %v2899_v2  ;;  %v1181_v2 = vld [vmem:[#allocation4 + $0x130] sm:$0xff] }
 0x4d2   :  { %2901 = vmatprep.subr.bf16.mxu1 %v3258_v0  ;;  %v1208_v39 = vld [vmem:[#allocation7 + $0x1] ss:$8 sm:$0x3] }
 0x4d3   :  { %2879 = vmatpush3.bf16.msra.mxu0 %v2878_v44  ;;  %v1086_v44 = vld [vmem:[#allocation2 + $0x640] sm:$0xff] }
 0x4d4   :  { %2880 = vmatprep.subr.bf16.mxu0 %v3258_v0  ;;  %v2920_v46 = vpack.c.bf16 %v1087_v45, %v1086_v44  ;;  %v76_v45 = vld [vmem:[%s3489_s0 + $0x18] sm:$0xff] }
 0x4d5   :  { %2903 = vmatpush3.bf16.msra.mxu1 %v2902_v5  ;;  %v2937_v5 = vpack.c.bf16 %v1181_v2, %v1179_v1  ;;  %v1298_v1 = vld [vmem:[#allocation2 + $0x698] sm:$0xff]  ;;  %v1315_v2 = vld [vmem:[#allocation2 + $0x720] sm:$0xff] }
 0x4d6   :  { %2904 = vmatprep.subr.bf16.mxu1 %v3258_v0 }
 0x4d7   :  { %2882 = vmatpush3.bf16.msra.mxu0 %v2881_v47  ;;  %v1088_v47 = vld [vmem:[#allocation2 + $0x650] sm:$0xff] }
 0x4d8   :  { %2907 = vmatprep.subr.bf16.mxu0 %v3258_v0  ;;  %v2923_v49 = vpack.c.bf16 %v1089_v48, %v1088_v47  ;;  %v1093_v47 = vld [vmem:[#allocation2 + $0x678] sm:$0xff] }
 0x4d9   :  { %2906 = vmatpush3.bf16.msra.mxu1 %v2905_v28 }
 0x4da   :  { %2932 = vmatprep.subr.bf16.mxu1 %v2931_v31  ;;  %v1197_v31 = vld [vmem:[#allocation4 + $0x1b0] sm:$0xff] }
 0x4db   :  { %v2953_v34 = vpack.c.bf16 %v1197_v31, %v1195_v30  ;;  %v1306_v30 = vld [vmem:[#allocation2 + $0x6d8] sm:$0xff]  ;;  %v1323_v31 = vld [vmem:[#allocation2 + $0x760] sm:$0xff] }
 0x58d   :  { %v2075_v6 = vpop.f32.mrb[6].mxu0  ;;  %v2110_v7 = vpop.f32.mrb[6].mxu1 }
 0x58e   :  { %v2076_v9 = vpop.f32.mrb[7].mxu0  ;;  %v2111_v11 = vpop.f32.mrb[7].mxu1 }
 0x58f   :  { %v2077_v14 = vadd.f32 %v2076_v9, %v2075_v6  ;;  %v2112_v16 = vadd.f32 %v2111_v11, %v2110_v7  ;;  %v2939_v6 = vpack.c.bf16 %v1186_v4, %v1184_v3  ;;  %v1183_v7 = vld [vmem:[#allocation4 + $0x140] sm:$0xff]  ;;  %v1188_v9 = vld [vmem:[#allocation4 + $0x168] sm:$0xff] }
 0x590   :  { %v1316_v3 = vld [vmem:[#allocation2 + $0x728] sm:$0xff] }
 0x591   :  { %v777_v17 = vadd.f32 %v2077_v14, %v1927_v8  ;;  %v890_v18 = vadd.f32 %v2112_v16, %v1929_v10  ;;  %v1185_v8 = vld [vmem:[#allocation4 + $0x150] sm:$0xff]  ;;  %v1190_v10 = vld [vmem:[#allocation4 + $0x178] sm:$0xff]  ;;  %v1187_v16 = vld [vmem:[#allocation4 + $0x160] sm:$0xff] }
 0x592   :  { %v2941_v11 = vpack.c.bf16 %v1185_v8, %v1183_v7  ;;  %v2943_v14 = vpack.c.bf16 %v1190_v10, %v1188_v9  ;;  %v1300_v7 = vld [vmem:[#allocation2 + $0x6a8] sm:$0xff]  ;;  %v1317_v8 = vld [vmem:[#allocation2 + $0x730] sm:$0xff]  ;;  %v1318_v9 = vld [vmem:[#allocation2 + $0x738] sm:$0xff] }
 0x593   :  { %v1928_v19 = vmul.f32 -1.442695, %v777_v17  ;;  %v893_v20 = vmax.f32 %v890_v18, 0.0  ;;  %v1189_v17 = vld [vmem:[#allocation4 + $0x170] sm:$0xff]  ;;  %v1192_v18 = vld [vmem:[#allocation4 + $0x188] sm:$0xff] }
 0x595   :  { %3144 = vpow2.f32 %v1928_v19  ;;  %2458 = vmatmul.mubr.f32.vlgmr.msra.gmra.mrb[8].mxu0 %v893_v20  ;;  %v1194_v19 = vld [vmem:[#allocation4 + $0x198] sm:$0xff]  ;;  %v2945_v20 = vpack.c.bf16 %v1189_v17, %v1187_v16  ;;  %v1319_v17 = vld [vmem:[#allocation2 + $0x740] sm:$0xff] }
 0x596   :  { %2527 = vmatprep.mubr.msk.f32.mxu0 %vm3259_vm0, %v3260_v12  ;;  %2909 = vmatpush3.bf16.msra.mxu0 %v2908_v35  ;;  %v2955_v35 = vpack.c.bf16 %v1202_v33, %v1200_v32  ;;  %v1302_v16 = vld [vmem:[#allocation2 + $0x6b8] sm:$0xff]  ;;  %v1324_v32 = vld [vmem:[#allocation2 + $0x768] sm:$0xff] }
 0x597   :  { %2910 = vmatprep.subr.bf16.mxu0 %v3258_v0 }
 0x59a   :  { %2912 = vmatpush3.bf16.msra.mxu0 %v2911_v37  ;;  %v1201_v37 = vld [vmem:[#allocation4 + $0x1d0] sm:$0xff] }
 0x59b   :  { %2913 = vmatprep.subr.bf16.mxu0 %v3258_v0 }
 0x59e   :  { %2915 = vmatpush3.bf16.msra.mxu0 %v2914_v40  ;;  %v2957_v40 = vpack.c.bf16 %v1201_v37, %v1199_v36  ;;  %v1308_v36 = vld [vmem:[#allocation2 + $0x6e8] sm:$0xff]  ;;  %v1325_v37 = vld [vmem:[#allocation2 + $0x770] sm:$0xff] }
 0x59f   :  { %v3145_v21 = vpop.eup %3144  ;;  %2916 = vmatprep.subr.bf16.mxu0 %v3258_v0 }
 0x5a0   :  { %v783_v22 = vadd.f32 1.0, %v3145_v21  ;;  %v2947_v21 = vpack.c.bf16 %v1194_v19, %v1192_v18  ;;  %v1320_v18 = vld [vmem:[#allocation2 + $0x748] sm:$0xff] }
 0x5a2   :  { %3146 = vrcp.f32 %v783_v22  ;;  %2918 = vmatpush3.bf16.msra.mxu0 %v2917_v43  ;;  %v1191_v22 = vld [vmem:[#allocation4 + $0x180] sm:$0xff]  ;;  %v1205_v43 = vld [vmem:[#allocation4 + $0x1f0] sm:$0xff] }
 0x5a3   :  { %2919 = vmatprep.subr.bf16.mxu0 %v3258_v0  ;;  %v2961_v44 = vpack.c.bf16 %v1205_v43, %v1203_v42  ;;  %v1309_v42 = vld [vmem:[#allocation2 + $0x6f0] sm:$0xff]  ;;  %v1310_v43 = vld [vmem:[#allocation2 + $0x6f8] sm:$0xff] }
 0x5a6   :  { %2921 = vmatpush3.bf16.msra.mxu0 %v2920_v46  ;;  %v1092_v46 = vld [vmem:[#allocation2 + $0x670] sm:$0xff] }
 0x5a7   :  { %2922 = vmatprep.subr.bf16.mxu0 %v3258_v0  ;;  %v2929_v48 = vpack.c.bf16 %v1093_v47, %v1092_v46  ;;  %v2993_v46 = vpack.c.bf16 %v1310_v43, %v1309_v42 }
 0x5aa   :  { %2924 = vmatpush3.bf16.msra.mxu0 %v2923_v49  ;;  %v1311_v49 = vld [vmem:[#allocation2 + $0x700] sm:$0xff] }
 0x5ab   :  { %2925 = vmatprep.subr.bf16.mxu0 %v3258_v0  ;;  %v2963_v51 = vpack.c.bf16 %v1312_v50, %v1311_v49 }
 0x5ac   :  { %v3147_v23 = vpop.eup %3146 }
 0x5ad   :  { %1910 = vst [vmem:[%s3494_s5] sm:$0xff] %v3147_v23  ;;  %v1193_v23 = vld [vmem:[#allocation4 + $0x190] sm:$0xff] }
 0x5ae   :  { %2927 = vmatpush3.bf16.msra.mxu0 %v2926_v52  ;;  %v2949_v28 = vpack.c.bf16 %v1193_v23, %v1191_v22  ;;  %v1931_v52 = vld [vmem:[#allocation6 + $0x8] ss:$0 sm:$0xff]  ;;  %v1321_v23 = vld [vmem:[#allocation2 + $0x750] sm:$0xff] }
 0x5af   :  { %2928 = vmatprep.subr.bf16.mxu0 %v3258_v0  ;;  %v1304_v22 = vld [vmem:[#allocation2 + $0x6c8] sm:$0xff] }
 0x5b2   :  { %2930 = vmatpush3.bf16.msra.mxu0 %v2929_v48 }
 0x5b3   :  { %2964 = vmatprep.subr.bf16.mxu0 %v2963_v51 }
 0x668   :  { %v981_v56 = vpop.f32.mrb[8].mxu0 }
 0x669   :  { %v982_v59 = vadd.f32 %v1930_v53, %v981_v56  ;;  %v2459_v60 = vpop.f32.mrb[9].mxu0  ;;  %v1295_v53 = vld [vmem:[#allocation2 + $0x680] sm:$0xff]  ;;  %v1313_v56 = vld [vmem:[#allocation2 + $0x710] sm:$0xff] }
 0x66a   :  { %v2965_v60 = vpack.c.bf16 %v1296_v54, %v1295_v53 }
 0x66b   :  { %v985_v62 = vmax.f32 %v982_v59, 0.0 }
 0x66d   :  { %2493 = vmatmul.mubr.f32.vlgmr.msra.gmra.mrb[8].mxu1 %v985_v62  ;;  %v2967_v62 = vpack.c.bf16 %v1314_v57, %v1313_v56  ;;  %v1404_v56 = vld [vmem:[#allocation2 + $0x788] sm:$0xff] }
 0x66e   :  { %2934 = vmatpush1.bf16.msra.mxu1 %v2933_v61  ;;  %1284 = vmatprep.mubr.f32.mxu1 %v3260_v12 }
 0x66f   :  { %2936 = vmatprep.subr.bf16.mxu1 %v2935_v63  ;;  %v1297_v63 = vld [vmem:[#allocation2 + $0x690] sm:$0xff] }
 0x670   :  { %v2969_v4 = vpack.c.bf16 %v1298_v1, %v1297_v63  ;;  %v1410_v63 = vld [vmem:[#allocation2 + $0x7b8] sm:$0xff] }
 0x672   :  { %2938 = vmatpush1.bf16.msra.mxu1 %v2937_v5  ;;  %v2971_v5 = vpack.c.bf16 %v1316_v3, %v1315_v2  ;;  %v1411_v2 = vld [vmem:[#allocation2 + $0x7c0] sm:$0xff]  ;;  %v1412_v3 = vld [vmem:[#allocation2 + $0x7c8] sm:$0xff] }
 0x673   :  { %2940 = vmatprep.subr.bf16.mxu1 %v2939_v6  ;;  %v1299_v6 = vld [vmem:[#allocation2 + $0x6a0] sm:$0xff] }
 0x674   :  { %v2973_v10 = vpack.c.bf16 %v1300_v7, %v1299_v6  ;;  %v1414_v6 = vld [vmem:[#allocation2 + $0x7d8] sm:$0xff] }
 0x676   :  { %2942 = vmatpush1.bf16.msra.mxu1 %v2941_v11  ;;  %v2975_v11 = vpack.c.bf16 %v1318_v9, %v1317_v8  ;;  %v1415_v8 = vld [vmem:[#allocation2 + $0x7e0] sm:$0xff]  ;;  %v1416_v9 = vld [vmem:[#allocation2 + $0x7e8] sm:$0xff] }
 0x677   :  { %2944 = vmatprep.subr.bf16.mxu1 %v2943_v14  ;;  %v1301_v14 = vld [vmem:[#allocation2 + $0x6b0] sm:$0xff] }
 0x678   :  { %v2977_v19 = vpack.c.bf16 %v1302_v16, %v1301_v14  ;;  %v1418_v14 = vld [vmem:[#allocation2 + $0x7f8] sm:$0xff] }
 0x67a   :  { %2946 = vmatpush1.bf16.msra.mxu1 %v2945_v20  ;;  %v2979_v20 = vpack.c.bf16 %v1320_v18, %v1319_v17  ;;  %v1495_v17 = vld [vmem:[#allocation2 + $0x800] sm:$0xff]  ;;  %v1496_v18 = vld [vmem:[#allocation2 + $0x808] sm:$0xff] }
 0x67b   :  { %2948 = vmatprep.subr.bf16.mxu1 %v2947_v21  ;;  %v1303_v21 = vld [vmem:[#allocation2 + $0x6c0] sm:$0xff] }
 0x67c   :  { %v2981_v27 = vpack.c.bf16 %v1304_v22, %v1303_v21  ;;  %v1498_v21 = vld [vmem:[#allocation2 + $0x818] sm:$0xff] }
 0x67e   :  { %2950 = vmatpush1.bf16.msra.mxu1 %v2949_v28  ;;  %v2983_v28 = vpack.c.bf16 %v1322_v25, %v1321_v23  ;;  %v1499_v23 = vld [vmem:[#allocation2 + $0x820] sm:$0xff]  ;;  %v1500_v25 = vld [vmem:[#allocation2 + $0x828] sm:$0xff] }
 0x67f   :  { %2952 = vmatprep.subr.bf16.mxu1 %v2951_v29  ;;  %v1305_v29 = vld [vmem:[#allocation2 + $0x6d0] sm:$0xff] }
 0x680   :  { %v2985_v33 = vpack.c.bf16 %v1306_v30, %v1305_v29  ;;  %v1502_v29 = vld [vmem:[#allocation2 + $0x838] sm:$0xff] }
 0x682   :  { %2954 = vmatpush1.bf16.msra.mxu1 %v2953_v34  ;;  %v2987_v34 = vpack.c.bf16 %v1324_v32, %v1323_v31  ;;  %v1503_v31 = vld [vmem:[#allocation2 + $0x840] sm:$0xff]  ;;  %v1504_v32 = vld [vmem:[#allocation2 + $0x848] sm:$0xff] }
 0x683   :  { %2956 = vmatprep.subr.bf16.mxu1 %v2955_v35  ;;  %v1307_v35 = vld [vmem:[#allocation2 + $0x6e0] sm:$0xff] }
 0x686   :  { %2958 = vmatpush1.bf16.msra.mxu1 %v2957_v40  ;;  %v2989_v40 = vpack.c.bf16 %v1308_v36, %v1307_v35  ;;  %v1506_v35 = vld [vmem:[#allocation2 + $0x858] sm:$0xff] }
 0x687   :  { %2960 = vmatprep.subr.bf16.mxu1 %v2959_v41  ;;  %v2991_v41 = vpack.c.bf16 %v1326_v38, %v1325_v37  ;;  %v1507_v37 = vld [vmem:[#allocation2 + $0x860] sm:$0xff]  ;;  %v1508_v38 = vld [vmem:[#allocation2 + $0x868] sm:$0xff] }
 0x68a   :  { %2962 = vmatpush1.bf16.msra.mxu1 %v2961_v44  ;;  %v1213_v44 = vrot.slane %v1208_v39, %v3397_v13 }
 0x68b   :  { %2995 = vmatprep.subr.bf16.mxu1 %v3258_v0 }
 0x68d   :  { %1285 = vmatmul.mubr.f32.vlgmr.msra.gmra.mrb[10].mxu1 %v76_v45  ;;  %v1217_v45 = vrot.slane %v1208_v39, %v3399_v15  ;;  %v3038_v39 = vpack.c.bf16 %v1508_v38, %v1507_v37  ;;  %v1613_v37 = vld [vmem:[#allocation4 + $0x2d0] sm:$0xff] }
 0x68e   :  { %2562 = vmatprep.mubr.msk.f32.mxu1 %vm3259_vm0, %v3260_v12 }
 0x740   :  { %v1073_v55 = vpop.f32.mrb[8].mxu1 }
 0x741   :  { %v1074_v58 = vadd.f32 %v1931_v52, %v1073_v55  ;;  %v2494_v59 = vpop.f32.mrb[9].mxu1  ;;  %v1403_v55 = vld [vmem:[#allocation2 + $0x780] sm:$0xff] }
 0x742   :  { %v2996_v57 = vpack.c.bf16 %v1404_v56, %v1403_v55  ;;  %v1406_v59 = vld [vmem:[#allocation2 + $0x798] sm:$0xff] }
 0x743   :  { %v1077_v61 = vmax.f32 %v1074_v58, 0.0  ;;  %v1405_v58 = vld [vmem:[#allocation2 + $0x790] sm:$0xff]  ;;  %v1510_v55 = vld [vmem:[#allocation2 + $0x878] sm:$0xff] }
 0x744   :  { %2997 = vmatpush3.bf16.msra.mxu1 %v2996_v57  ;;  %v1588_v57 = vld [vmem:[#allocation4 + $0x208] sm:$0xff] }
 0x745   :  { %2528 = vmatmul.mubr.f32.vlgmr.msra.gmra.mrb[10].mxu0 %v1077_v61  ;;  %2998 = vmatprep.subr.bf16.mxu1 %v3258_v0  ;;  %v1408_v61 = vld [vmem:[#allocation2 + $0x7a8] sm:$0xff] }
 0x746   :  { %2966 = vmatpush3.bf16.msra.mxu0 %v2965_v60  ;;  %v2999_v60 = vpack.c.bf16 %v1406_v59, %v1405_v58  ;;  %v1590_v58 = vld [vmem:[#allocation4 + $0x218] sm:$0xff]  ;;  %v1587_v59 = vld [vmem:[#allocation4 + $0x200] sm:$0xff] }
 0x747   :  { %2968 = vmatprep.subr.bf16.mxu0 %v2967_v62  ;;  %v1409_v62 = vld [vmem:[#allocation2 + $0x7b0] sm:$0xff] }
 0x748   :  { %3000 = vmatpush3.bf16.msra.mxu1 %v2999_v60  ;;  %v3005_v1 = vpack.c.bf16 %v1410_v63, %v1409_v62  ;;  %v3043_v60 = vpack.c.bf16 %v1590_v58, %v1588_v57 }
 0x749   :  { %3001 = vmatprep.subr.bf16.mxu1 %v3258_v0 }
 0x74a   :  { %2970 = vmatpush3.bf16.msra.mxu0 %v2969_v4  ;;  %v3008_v4 = vpack.c.bf16 %v1412_v3, %v1411_v2  ;;  %v1593_v2 = vld [vmem:[#allocation4 + $0x230] sm:$0xff]  ;;  %v1596_v3 = vld [vmem:[#allocation4 + $0x248] sm:$0xff] }
 0x74b   :  { %2972 = vmatprep.subr.bf16.mxu0 %v2971_v5  ;;  %v1413_v5 = vld [vmem:[#allocation2 + $0x7d0] sm:$0xff] }
 0x74c   :  { %v3011_v7 = vpack.c.bf16 %v1414_v6, %v1413_v5 }
 0x74e   :  { %2974 = vmatpush3.bf16.msra.mxu0 %v2973_v10  ;;  %v3014_v10 = vpack.c.bf16 %v1416_v9, %v1415_v8  ;;  %v1597_v8 = vld [vmem:[#allocation4 + $0x250] sm:$0xff]  ;;  %v1600_v9 = vld [vmem:[#allocation4 + $0x268] sm:$0xff] }
 0x74f   :  { %2976 = vmatprep.subr.bf16.mxu0 %v2975_v11  ;;  %v1417_v11 = vld [vmem:[#allocation2 + $0x7f0] sm:$0xff] }
 0x750   :  { %v3017_v16 = vpack.c.bf16 %v1418_v14, %v1417_v11 }
 0x752   :  { %2978 = vmatpush3.bf16.msra.mxu0 %v2977_v19  ;;  %v1497_v19 = vld [vmem:[#allocation2 + $0x810] sm:$0xff] }
 0x753   :  { %2980 = vmatprep.subr.bf16.mxu0 %v2979_v20  ;;  %v3020_v20 = vpack.c.bf16 %v1496_v18, %v1495_v17  ;;  %v3023_v22 = vpack.c.bf16 %v1498_v21, %v1497_v19  ;;  %v1601_v17 = vld [vmem:[#allocation4 + $0x270] sm:$0xff]  ;;  %v1604_v18 = vld [vmem:[#allocation4 + $0x288] sm:$0xff]  ;;  %v1606_v19 = vld [vmem:[#allocation4 + $0x298] sm:$0xff] }
 0x754   :  { %v3059_v21 = vpack.c.bf16 %v1606_v19, %v1604_v18  ;;  %v1732_v18 = vld [vmem:[#allocation2 + $0x958] sm:$0xff] }
 0x756   :  { %2982 = vmatpush3.bf16.msra.mxu0 %v2981_v27  ;;  %v3026_v27 = vpack.c.bf16 %v1500_v25, %v1499_v23  ;;  %v1605_v23 = vld [vmem:[#allocation4 + $0x290] sm:$0xff]  ;;  %v1608_v25 = vld [vmem:[#allocation4 + $0x2a8] sm:$0xff] }
 0x757   :  { %2984 = vmatprep.subr.bf16.mxu0 %v2983_v28  ;;  %v1501_v28 = vld [vmem:[#allocation2 + $0x830] sm:$0xff] }
 0x758   :  { %v3029_v30 = vpack.c.bf16 %v1502_v29, %v1501_v28 }
 0x75a   :  { %2986 = vmatpush3.bf16.msra.mxu0 %v2985_v33  ;;  %v3032_v33 = vpack.c.bf16 %v1504_v32, %v1503_v31  ;;  %v1609_v31 = vld [vmem:[#allocation4 + $0x2b0] sm:$0xff]  ;;  %v1612_v32 = vld [vmem:[#allocation4 + $0x2c8] sm:$0xff] }
 0x75b   :  { %2988 = vmatprep.subr.bf16.mxu0 %v2987_v34  ;;  %v1505_v34 = vld [vmem:[#allocation2 + $0x850] sm:$0xff] }
 0x75c   :  { %v3035_v36 = vpack.c.bf16 %v1506_v35, %v1505_v34 }
 0x75e   :  { %2990 = vmatpush3.bf16.msra.mxu0 %v2989_v40  ;;  %v1932_v40 = vld [vmem:[#allocation6 + $0x9] ss:$0 sm:$0xff] }
 0x75f   :  { %2992 = vmatprep.subr.bf16.mxu0 %v2991_v41 }
 0x760   :  { %v1286_v47 = vpop.f32.mrb[10].mxu1 }
 0x761   :  { %v1287_v48 = vadd.f32 %v1286_v47, %v1213_v44  ;;  %v1288_v49 = vpop.f32.mrb[11].mxu1 }
 0x762   :  { %v1289_v50 = vadd.f32 %v1288_v49, %v1217_v45  ;;  %2994 = vmatpush3.bf16.msra.mxu0 %v2993_v46  ;;  %v1934_v49 = vld [vmem:[#allocation6 + $0xa] ss:$0 sm:$0xff] }
 0x763   :  { %v1291_v51 = vmax.f32 %v1287_v48, 0.0  ;;  %3019 = vmatprep.subr.bf16.mxu0 %v3258_v0 }
 0x764   :  { %v1292_v52 = vmax.f32 %v1289_v50, 0.0 }
 0x765   :  { %v1293_v54 = vadd.f32 %v1291_v51, %v3405_v26 }
 0x766   :  { %v1294_v53 = vadd.f32 %v1292_v52, %v3403_v24  ;;  %v1407_v24 = vld [vmem:[#allocation2 + $0x7a0] sm:$0xff] }
 0x767   :  { %v3002_v26 = vpack.c.bf16 %v1408_v61, %v1407_v24  ;;  %v1589_v24 = vld [vmem:[#allocation4 + $0x210] sm:$0xff]  ;;  %v1592_v61 = vld [vmem:[#allocation4 + $0x228] sm:$0xff] }
 0x768   :  { %1396 = vmatprep.mubr.f32.mxu0 %v1294_v53  ;;  %v3045_v62 = vpack.c.bf16 %v1589_v24, %v1587_v59  ;;  %v1707_v59 = vld [vmem:[#allocation2 + $0x890] sm:$0xff]  ;;  %v1725_v24 = vld [vmem:[#allocation2 + $0x920] sm:$0xff] }
 0x769   :  { %1397 = vmatmul.mubr.f32.vlgmr.msra.gmra.mrb[12].mxu0 %v1293_v54  ;;  %3003 = vmatpush3.bf16.msra.mxu1 %v3002_v26  ;;  %v1509_v54 = vld [vmem:[#allocation2 + $0x870] sm:$0xff]  ;;  %v1594_v26 = vld [vmem:[#allocation4 + $0x238] sm:$0xff] }
 0x76a   :  { %2597 = vmatprep.mubr.msk.f32.mxu0 %vm3259_vm0, %v3260_v12  ;;  %3004 = vmatprep.subr.bf16.mxu1 %v3258_v0  ;;  %v3041_v56 = vpack.c.bf16 %v1510_v55, %v1509_v54  ;;  %v3047_v63 = vpack.c.bf16 %v1594_v26, %v1592_v61  ;;  %v1706_v54 = vld [vmem:[#allocation2 + $0x888] sm:$0xff]  ;;  %v1723_v55 = vld [vmem:[#allocation2 + $0x910] sm:$0xff] }
 0x76b   :  { %3021 = vmatpush3.bf16.msra.mxu0 %v3020_v20  ;;  %v1726_v61 = vld [vmem:[#allocation2 + $0x928] sm:$0xff] }
 0x76c   :  { %3022 = vmatprep.subr.bf16.mxu0 %v3258_v0 }
 0x76d   :  { %3006 = vmatpush3.bf16.msra.mxu1 %v3005_v1  ;;  %v1591_v1 = vld [vmem:[#allocation4 + $0x220] sm:$0xff] }
 0x76e   :  { %3007 = vmatprep.subr.bf16.mxu1 %v3258_v0  ;;  %v3049_v5 = vpack.c.bf16 %v1593_v2, %v1591_v1  ;;  %v1710_v1 = vld [vmem:[#allocation2 + $0x8a8] sm:$0xff]  ;;  %v1727_v2 = vld [vmem:[#allocation2 + $0x930] sm:$0xff] }
 0x76f   :  { %3024 = vmatpush3.bf16.msra.mxu0 %v3023_v22  ;;  %v1603_v22 = vld [vmem:[#allocation4 + $0x280] sm:$0xff] }
 0x770   :  { %3025 = vmatprep.subr.bf16.mxu0 %v3258_v0  ;;  %v3061_v28 = vpack.c.bf16 %v1605_v23, %v1603_v22  ;;  %v1716_v22 = vld [vmem:[#allocation2 + $0x8d8] sm:$0xff]  ;;  %v1733_v23 = vld [vmem:[#allocation2 + $0x960] sm:$0xff] }
 0x771   :  { %3009 = vmatpush3.bf16.msra.mxu1 %v3008_v4  ;;  %v1598_v4 = vld [vmem:[#allocation4 + $0x258] sm:$0xff] }
 0x772   :  { %3010 = vmatprep.subr.bf16.mxu1 %v3258_v0  ;;  %v3051_v6 = vpack.c.bf16 %v1598_v4, %v1596_v3  ;;  %v1728_v3 = vld [vmem:[#allocation2 + $0x938] sm:$0xff] }
 0x773   :  { %3027 = vmatpush3.bf16.msra.mxu0 %v3026_v27  ;;  %v1610_v27 = vld [vmem:[#allocation4 + $0x2b8] sm:$0xff] }
 0x774   :  { %3028 = vmatprep.subr.bf16.mxu0 %v3258_v0  ;;  %v3063_v29 = vpack.c.bf16 %v1610_v27, %v1608_v25  ;;  %v1734_v25 = vld [vmem:[#allocation2 + $0x968] sm:$0xff] }
 0x775   :  { %3012 = vmatpush3.bf16.msra.mxu1 %v3011_v7  ;;  %v1595_v7 = vld [vmem:[#allocation4 + $0x240] sm:$0xff] }
 0x776   :  { %3013 = vmatprep.subr.bf16.mxu1 %v3258_v0  ;;  %v3053_v11 = vpack.c.bf16 %v1597_v8, %v1595_v7  ;;  %v1712_v7 = vld [vmem:[#allocation2 + $0x8b8] sm:$0xff]  ;;  %v1729_v8 = vld [vmem:[#allocation2 + $0x940] sm:$0xff] }
 0x777   :  { %3030 = vmatpush3.bf16.msra.mxu0 %v3029_v30  ;;  %v1607_v30 = vld [vmem:[#allocation4 + $0x2a0] sm:$0xff] }
 0x778   :  { %3031 = vmatprep.subr.bf16.mxu0 %v3258_v0  ;;  %v3065_v34 = vpack.c.bf16 %v1609_v31, %v1607_v30 }
 0x779   :  { %3015 = vmatpush3.bf16.msra.mxu1 %v3014_v10  ;;  %v1602_v10 = vld [vmem:[#allocation4 + $0x278] sm:$0xff] }
 0x77a   :  { %3016 = vmatprep.subr.bf16.mxu1 %v3258_v0  ;;  %v3055_v14 = vpack.c.bf16 %v1602_v10, %v1600_v9  ;;  %v1730_v9 = vld [vmem:[#allocation2 + $0x948] sm:$0xff] }
 0x77b   :  { %3033 = vmatpush3.bf16.msra.mxu0 %v3032_v33  ;;  %v1614_v33 = vld [vmem:[#allocation4 + $0x2d8] sm:$0xff] }
 0x77c   :  { %3034 = vmatprep.subr.bf16.mxu0 %v3258_v0  ;;  %v3067_v35 = vpack.c.bf16 %v1614_v33, %v1612_v32 }
 0x77d   :  { %3018 = vmatpush3.bf16.msra.mxu1 %v3017_v16  ;;  %v1599_v16 = vld [vmem:[#allocation4 + $0x260] sm:$0xff] }
 0x77e   :  { %3044 = vmatprep.subr.bf16.mxu1 %v3043_v60  ;;  %v3057_v20 = vpack.c.bf16 %v1601_v17, %v1599_v16  ;;  %v1708_v60 = vld [vmem:[#allocation2 + $0x898] sm:$0xff]  ;;  %v1714_v16 = vld [vmem:[#allocation2 + $0x8c8] sm:$0xff]  ;;  %v1731_v17 = vld [vmem:[#allocation2 + $0x950] sm:$0xff] }
 0x77f   :  { %3036 = vmatpush3.bf16.msra.mxu0 %v3035_v36  ;;  %v1611_v36 = vld [vmem:[#allocation4 + $0x2c0] sm:$0xff]  ;;  %v3081_v26 = vpack.c.bf16 %v1708_v60, %v1707_v59  ;;  %v1620_v60 = vld [vmem:[#allocation7 + $0x2] ss:$8 sm:$0x3] }
 0x780   :  { %3037 = vmatprep.subr.bf16.mxu0 %v3258_v0  ;;  %v3069_v38 = vpack.c.bf16 %v1613_v37, %v1611_v36  ;;  %v1735_v37 = vld [vmem:[#allocation2 + $0x970] sm:$0xff] }
 0x783   :  { %3039 = vmatpush3.bf16.msra.mxu0 %v3038_v39  ;;  %v1935_v39 = vld [vmem:[#allocation6 + $0xb] ss:$0 sm:$0xff] }
 0x784   :  { %3040 = vmatprep.subr.bf16.mxu0 %v3258_v0 }
 0x787   :  { %3042 = vmatpush3.bf16.msra.mxu0 %v3041_v56  ;;  %v1724_v56 = vld [vmem:[#allocation2 + $0x918] sm:$0xff] }
 0x788   :  { %v3079_v58 = vpack.c.bf16 %v1724_v56, %v1723_v55  ;;  %v1822_v55 = vld [vmem:[#allocation2 + $0x9c8] sm:$0xff] }
 0x818   :  { %v1165_v41 = vpop.f32.mrb[10].mxu0 }
 0x819   :  { %v1166_v42 = vadd.f32 %v1932_v40, %v1165_v41  ;;  %v2529_v43 = vpop.f32.mrb[11].mxu0 }
 0x81b   :  { %v1933_v44 = vmul.f32 -1.442695, %v1166_v42 }
 0x81d   :  { %3148 = vpow2.f32 %v1933_v44  ;;  %v1616_v44 = vld [vmem:[#allocation4 + $0x2e8] sm:$0xff] }
 0x827   :  { %v3149_v45 = vpop.eup %3148 }
 0x828   :  { %v1172_v46 = vadd.f32 1.0, %v3149_v45  ;;  %v1618_v45 = vld [vmem:[#allocation4 + $0x2f8] sm:$0xff] }
 0x82a   :  { %3150 = vrcp.f32 %v1172_v46  ;;  %v3071_v46 = vpack.c.bf16 %v1618_v45, %v1616_v44  ;;  %v1814_v44 = vld [vmem:[#allocation2 + $0x988] sm:$0xff]  ;;  %v1815_v45 = vld [vmem:[#allocation2 + $0x990] sm:$0xff] }
 0x834   :  { %v3151_v47 = vpop.eup %3150 }
 0x835   :  { %1912 = vst [vmem:[%s3494_s5 + $0x10] sm:$0xff] %v3151_v47  ;;  %v1615_v47 = vld [vmem:[#allocation4 + $0x2e0] sm:$0xff] }
 0x83c   :  { %v2196_v48 = vpop.f32.mrb[12].mxu0 }
 0x83d   :  { %v2197_v50 = vpop.f32.mrb[13].mxu0 }
 0x83e   :  { %v2198_v51 = vadd.f32 %v2197_v50, %v2196_v48  ;;  %v1617_v48 = vld [vmem:[#allocation4 + $0x2f0] sm:$0xff]  ;;  %v1721_v50 = vld [vmem:[#allocation2 + $0x900] sm:$0xff] }
 0x840   :  { %v1399_v52 = vadd.f32 %v2198_v51, %v1934_v49  ;;  %v3073_v49 = vpack.c.bf16 %v1617_v48, %v1615_v47  ;;  %v1722_v51 = vld [vmem:[#allocation2 + $0x908] sm:$0xff]  ;;  %v1816_v47 = vld [vmem:[#allocation2 + $0x998] sm:$0xff] }
 0x841   :  { %v3111_v48 = vpack.c.bf16 %v1816_v47, %v1815_v45 }
 0x842   :  { %v1402_v53 = vmax.f32 %v1399_v52, 0.0  ;;  %v1705_v52 = vld [vmem:[#allocation2 + $0x880] sm:$0xff] }
 0x843   :  { %v3077_v57 = vpack.c.bf16 %v1706_v54, %v1705_v52  ;;  %v1820_v52 = vld [vmem:[#allocation2 + $0x9b8] sm:$0xff]  ;;  %v1821_v54 = vld [vmem:[#allocation2 + $0x9c0] sm:$0xff] }
 0x844   :  { %2563 = vmatmul.mubr.f32.vlgmr.msra.gmra.mrb[12].mxu1 %v1402_v53  ;;  %v3075_v53 = vpack.c.bf16 %v1722_v51, %v1721_v50  ;;  %v1819_v51 = vld [vmem:[#allocation2 + $0x9b0] sm:$0xff]  ;;  %v3120_v56 = vpack.c.bf16 %v1822_v55, %v1821_v54 }
 0x845   :  { %1696 = vmatprep.mubr.f32.mxu1 %v3260_v12  ;;  %3046 = vmatpush1.bf16.msra.mxu1 %v3045_v62  ;;  %v3083_v62 = vpack.c.bf16 %v1726_v61, %v1725_v24  ;;  %v1625_v24 = vrot.slane %v1620_v60, %v3397_v13  ;;  %v1629_v61 = vrot.slane %v1620_v60, %v3399_v15  ;;  %v1937_v15 = vld [vmem:[#allocation6 + $0xd] ss:$0 sm:$0xff] }
 0x846   :  { %3048 = vmatprep.subr.bf16.mxu1 %v3047_v63  ;;  %3076 = vmatprep.subr.bf16.mxu0 %v3075_v53  ;;  %v1709_v63 = vld [vmem:[#allocation2 + $0x8a0] sm:$0xff]  ;;  %v3117_v53 = vpack.c.bf16 %v1820_v52, %v1819_v51 }
 0x847   :  { %v3085_v4 = vpack.c.bf16 %v1710_v1, %v1709_v63 }
 0x849   :  { %3050 = vmatpush1.bf16.msra.mxu1 %v3049_v5  ;;  %v3087_v5 = vpack.c.bf16 %v1728_v3, %v1727_v2 }
 0x84a   :  { %3052 = vmatprep.subr.bf16.mxu1 %v3051_v6  ;;  %v1711_v6 = vld [vmem:[#allocation2 + $0x8b0] sm:$0xff] }
 0x84b   :  { %v3089_v10 = vpack.c.bf16 %v1712_v7, %v1711_v6  ;;  %v1827_v7 = vld [vmem:[#allocation2 + $0x9f0] sm:$0xff] }
 0x84d   :  { %3054 = vmatpush1.bf16.msra.mxu1 %v3053_v11  ;;  %v3091_v11 = vpack.c.bf16 %v1730_v9, %v1729_v8  ;;  %v1828_v8 = vld [vmem:[#allocation2 + $0x9f8] sm:$0xff] }
 0x84e   :  { %3056 = vmatprep.subr.bf16.mxu1 %v3055_v14  ;;  %v1713_v14 = vld [vmem:[#allocation2 + $0x8c0] sm:$0xff]  ;;  %v3129_v9 = vpack.c.bf16 %v1828_v8, %v1827_v7 }
 0x84f   :  { %v3093_v19 = vpack.c.bf16 %v1714_v16, %v1713_v14 }
 0x851   :  { %3058 = vmatpush1.bf16.msra.mxu1 %v3057_v20  ;;  %v3095_v20 = vpack.c.bf16 %v1732_v18, %v1731_v17  ;;  %v1938_v17 = vld [vmem:[#allocation6 + $0xe] ss:$0 sm:$0xff] }
 0x852   :  { %3060 = vmatprep.subr.bf16.mxu1 %v3059_v21  ;;  %v1715_v21 = vld [vmem:[#allocation2 + $0x8d0] sm:$0xff] }
 0x853   :  { %v3097_v27 = vpack.c.bf16 %v1716_v22, %v1715_v21 }
 0x855   :  { %3062 = vmatpush1.bf16.msra.mxu1 %v3061_v28  ;;  %v3099_v28 = vpack.c.bf16 %v1734_v25, %v1733_v23 }
 0x856   :  { %3064 = vmatprep.subr.bf16.mxu1 %v3063_v29  ;;  %v1936_v29 = vld [vmem:[#allocation6 + $0xc] ss:$0 sm:$0xff] }
 0x859   :  { %3066 = vmatpush1.bf16.msra.mxu1 %v3065_v34  ;;  %v1717_v34 = vld [vmem:[#allocation2 + $0x8e0] sm:$0xff] }
 0x85a   :  { %3068 = vmatprep.subr.bf16.mxu1 %v3067_v35  ;;  %v1718_v35 = vld [vmem:[#allocation2 + $0x8e8] sm:$0xff] }
 0x85b   :  { %v3101_v36 = vpack.c.bf16 %v1718_v35, %v1717_v34 }
 0x85d   :  { %3070 = vmatpush1.bf16.msra.mxu1 %v3069_v38  ;;  %v1736_v38 = vld [vmem:[#allocation2 + $0x978] sm:$0xff] }
 0x85e   :  { %3072 = vmatprep.subr.bf16.mxu1 %v3071_v46 }
 0x861   :  { %3074 = vmatpush1.bf16.msra.mxu1 %v3073_v49  ;;  %v1818_v49 = vld [vmem:[#allocation2 + $0x9a8] sm:$0xff] }
 0x862   :  { %3107 = vmatprep.subr.bf16.mxu1 %v3258_v0 }
 0x917   :  { %v1490_v40 = vpop.f32.mrb[12].mxu1 }
 0x918   :  { %v1491_v41 = vadd.f32 %v1935_v39, %v1490_v40  ;;  %v2564_v42 = vpop.f32.mrb[13].mxu1  ;;  %v3103_v39 = vpack.c.bf16 %v1736_v38, %v1735_v37  ;;  %v1719_v40 = vld [vmem:[#allocation2 + $0x8f0] sm:$0xff] }
 0x91a   :  { %v1494_v43 = vmax.f32 %v1491_v41, 0.0  ;;  %v1720_v41 = vld [vmem:[#allocation2 + $0x8f8] sm:$0xff] }
 0x91b   :  { %v3105_v42 = vpack.c.bf16 %v1720_v41, %v1719_v40 }
 0x91c   :  { %2598 = vmatmul.mubr.f32.vlgmr.msra.gmra.mrb[14].mxu0 %v1494_v43  ;;  %v1813_v43 = vld [vmem:[#allocation2 + $0x980] sm:$0xff] }
 0x91d   :  { %3078 = vmatpush3.bf16.msra.mxu0 %v3077_v57  ;;  %v3108_v46 = vpack.c.bf16 %v1814_v44, %v1813_v43  ;;  %v1823_v57 = vld [vmem:[#allocation2 + $0x9d0] sm:$0xff] }
 0x91e   :  { %3080 = vmatprep.subr.bf16.mxu0 %v3079_v58  ;;  %v1824_v58 = vld [vmem:[#allocation2 + $0x9d8] sm:$0xff] }
 0x91f   :  { %v3123_v59 = vpack.c.bf16 %v1824_v58, %v1823_v57 }
 0x921   :  { %3082 = vmatpush3.bf16.msra.mxu0 %v3081_v26 }
 0x922   :  { %3084 = vmatprep.subr.bf16.mxu0 %v3083_v62 }
 0x925   :  { %3086 = vmatpush3.bf16.msra.mxu0 %v3085_v4  ;;  %v1825_v4 = vld [vmem:[#allocation2 + $0x9e0] sm:$0xff] }
 0x926   :  { %3088 = vmatprep.subr.bf16.mxu0 %v3087_v5  ;;  %v1826_v5 = vld [vmem:[#allocation2 + $0x9e8] sm:$0xff] }
 0x927   :  { %v3126_v6 = vpack.c.bf16 %v1826_v5, %v1825_v4 }
 0x929   :  { %3090 = vmatpush3.bf16.msra.mxu0 %v3089_v10 }
 0x92a   :  { %3092 = vmatprep.subr.bf16.mxu0 %v3091_v11 }
 0x92d   :  { %3094 = vmatpush3.bf16.msra.mxu0 %v3093_v19 }
 0x92e   :  { %3096 = vmatprep.subr.bf16.mxu0 %v3095_v20 }
 0x931   :  { %3098 = vmatpush3.bf16.msra.mxu0 %v3097_v27 }
 0x932   :  { %3100 = vmatprep.subr.bf16.mxu0 %v3099_v28 }
 0x935   :  { %3102 = vmatpush3.bf16.msra.mxu0 %v3101_v36 }
 0x936   :  { %3104 = vmatprep.subr.bf16.mxu0 %v3103_v39 }
 0x939   :  { %3106 = vmatpush3.bf16.msra.mxu0 %v3105_v42 }
 0x9ef   :  { %v1582_v30 = vpop.f32.mrb[14].mxu0 }
 0x9f0   :  { %v1583_v31 = vadd.f32 %v1936_v29, %v1582_v30  ;;  %v2599_v32 = vpop.f32.mrb[15].mxu0 }
 0x9f2   :  { %v1586_v33 = vmax.f32 %v1583_v31, 0.0 }
 0x9f4   :  { %1697 = vmatmul.mubr.f32.vlgmr.msra.gmra.mrb[14].mxu1 %v1586_v33 }
 0x9f5   :  { %2632 = vmatprep.mubr.msk.f32.mxu1 %vm3259_vm0, %v3260_v12  ;;  %3109 = vmatpush3.bf16.msra.mxu1 %v3108_v46  ;;  %v1817_v12 = vld [vmem:[#allocation2 + $0x9a0] sm:$0xff] }
 0x9f6   :  { %3110 = vmatprep.subr.bf16.mxu1 %v3258_v0  ;;  %v3114_v50 = vpack.c.bf16 %v1818_v49, %v1817_v12 }
 0x9f9   :  { %3112 = vmatpush3.bf16.msra.mxu1 %v3111_v48 }
 0x9fa   :  { %3113 = vmatprep.subr.bf16.mxu1 %v3258_v0 }
 0x9fd   :  { %3115 = vmatpush3.bf16.msra.mxu1 %v3114_v50 }
 0x9fe   :  { %3116 = vmatprep.subr.bf16.mxu1 %v3258_v0 }
 0xa01   :  { %3118 = vmatpush3.bf16.msra.mxu1 %v3117_v53 }
 0xa02   :  { %3119 = vmatprep.subr.bf16.mxu1 %v3258_v0 }
 0xa05   :  { %3121 = vmatpush3.bf16.msra.mxu1 %v3120_v56 }
 0xa06   :  { %3122 = vmatprep.subr.bf16.mxu1 %v3258_v0 }
 0xa09   :  { %3124 = vmatpush3.bf16.msra.mxu1 %v3123_v59 }
 0xa0a   :  { %3125 = vmatprep.subr.bf16.mxu1 %v3258_v0 }
 0xa0d   :  { %3127 = vmatpush3.bf16.msra.mxu1 %v3126_v6 }
 0xa0e   :  { %3128 = vmatprep.subr.bf16.mxu1 %v3258_v0 }
 0xa11   :  { %3130 = vmatpush3.bf16.msra.mxu1 %v3129_v9 }
 0xac7   :  { %v1698_v26 = vpop.f32.mrb[14].mxu1 }
 0xac8   :  { %v1699_v62 = vadd.f32 %v1698_v26, %v1625_v24  ;;  %v1700_v63 = vpop.f32.mrb[15].mxu1 }
 0xac9   :  { %v1701_v1 = vadd.f32 %v1700_v63, %v1629_v61 }
 0xaca   :  { %v1703_v3 = vmax.f32 %v1699_v62, 0.0 }
 0xacb   :  { %v1704_v2 = vmax.f32 %v1701_v1, 0.0 }
 0xacd   :  { %1806 = vmatprep.mubr.f32.mxu0 %v1704_v2 }
 0xace   :  { %1807 = vmatmul.mubr.f32.vlgmr.msra.gmra.mrb[16].mxu0 %v1703_v3 }
 0xba1   :  { %v2265_v13 = vpop.f32.mrb[16].mxu0 }
 0xba2   :  { %v2266_v10 = vpop.f32.mrb[17].mxu0 }
 0xba3   :  { %v2267_v11 = vadd.f32 %v2266_v10, %v2265_v13 }
 0xba5   :  { %v1809_v14 = vadd.f32 %v2267_v11, %v1937_v15 }
 0xba7   :  { %v1812_v16 = vmax.f32 %v1809_v14, 0.0 }
 0xba9   :  { %2633 = vmatmul.mubr.f32.vlgmr.msra.gmra.mrb[16].mxu1 %v1812_v16 }
 0xc7c   :  { %v1900_v18 = vpop.f32.mrb[16].mxu1 }
 0xc7d   :  { %v1901_v19 = vadd.f32 %v1938_v17, %v1900_v18  ;;  %v2634_v20 = vpop.f32.mrb[17].mxu1 }
 0xc7f   :  { %v1939_v21 = vmul.f32 -1.442695, %v1901_v19 }
 0xc81   :  { %3152 = vpow2.f32 %v1939_v21 }
 0xc8b   :  { %v3153_v22 = vpop.eup %3152 }
 0xc8c   :  { %v1907_v23 = vadd.f32 1.0, %v3153_v22 }
 0xc8e   :  { %3154 = vrcp.f32 %v1907_v23 }
 0xc98   :  { %v3155_v0 = vpop.eup %3154 }
 0xc99   :  { %1911 = vst [vmem:[%s3494_s5 + $0x8] sm:$0xff] %v3155_v0 }
 0xc9a   :  { %1919 = vsyncpa [#allocation3], 1 }
 0xc9b   :  { %1920 = vsyncpa [#allocation5], 1 }
 0xc9c   :  { %1921 = vsyncpa [#allocation8], 1 }

</bundles_post_ra>
